<compile_context>
chip_gen: v7x
topology: tpu7x:2x2x1
jax: 0.10.0
libtpu: 0.0.40
codegen_flags: <defaults>
</compile_context>

<pallas_src>
import functools

import jax
import jax.numpy as jnp
import numpy as np
from jax.experimental import pallas as pl
from jax.experimental.pallas import tpu as pltpu

LN_EPS = 1e-5  # torch.nn.LayerNorm default


def _layer_norm_f32(y, gamma, beta):
    """LayerNorm over the last axis, f32 statistics, biased variance (torch)."""
    mu = jnp.mean(y, axis=-1, keepdims=True)
    var = jnp.mean((y - mu) ** 2, axis=-1, keepdims=True)
    return (y - mu) * jax.lax.rsqrt(var + LN_EPS) * gamma + beta


# ---------------------------------------------------------------------------
# Fused kernel: MHA (+res+LN+mask) followed by FFN (+res+LN+mask).
# grid = (B,), one batch element per grid step ("parallel").
# ---------------------------------------------------------------------------
def encoder_layer_kernel(x_ref, wqkv_ref, bqkv_ref, wo_ref, bo_ref,
                         ln1g_ref, ln1b_ref, w1_ref, b1_ref, w2_ref, b2_ref,
                         ln2g_ref, ln2b_ref, *rest,
                         n_head, d_k, d_v, has_mask, has_npm):
    idx = 0
    if has_npm:
        npm_ref = rest[idx]; idx += 1                  # (1, L, 1) non-pad mask
    if has_mask:
        bias_ref = rest[idx]; idx += 1                 # (1, L, L) additive bias
    out_ref, attn_ref = rest[idx], rest[idx + 1]

    x = x_ref[0]                                       # (L, D), input dtype (MXU operand)
    L, _ = x.shape
    x32 = x.astype(jnp.float32)                        # f32 copy for residual / LN stats
    hdk = n_head * d_k
    hdv = n_head * d_v

    # ---- fused QKV projection: one (L, D) @ (D, 2*H*dk + H*dv) matmul ----
    qkv = (jnp.dot(x, wqkv_ref[...], preferred_element_type=jnp.float32)
           + bqkv_ref[...]).astype(x.dtype)            # (L, 2*hdk + hdv)

    q = qkv[:, :hdk].reshape(L, n_head, d_k).transpose(1, 0, 2)          # (H, L, dk)
    k = qkv[:, hdk:2 * hdk].reshape(L, n_head, d_k).transpose(1, 0, 2)   # (H, L, dk)
    v = qkv[:, 2 * hdk:].reshape(L, n_head, d_v).transpose(1, 0, 2)      # (H, L, dv)

    # ---- batched-head scaled dot-product attention ----
    scale = 1.0 / (d_k ** 0.5)
    s = jnp.einsum('hld,hmd->hlm', q, k,
                   preferred_element_type=jnp.float32) * scale           # (H, L, L)
    if has_mask:
        s = s + bias_ref[0][None, :, :]

    s = s - jnp.max(s, axis=-1, keepdims=True)
    e = jnp.exp(s)
    a = e * pl.reciprocal(jnp.sum(e, axis=-1, keepdims=True), approx=True)  # (H, L, L)
    # Head-major output block (H, 1, L, L): no post-kernel transpose needed.
    attn_ref[...] = a.reshape(n_head, 1, L, L).astype(attn_ref.dtype)

    ctx = jnp.einsum('hlm,hmd->hld', a.astype(x.dtype), v,
                     preferred_element_type=jnp.float32)                 # (H, L, dv)
    ctx = ctx.transpose(1, 0, 2).reshape(L, hdv).astype(x.dtype)         # head concat

    o = jnp.dot(ctx, wo_ref[...], preferred_element_type=jnp.float32) + bo_ref[...]
    y = _layer_norm_f32(o + x32, ln1g_ref[...], ln1b_ref[...])           # res=True
    if has_npm:
        y = y * npm_ref[0]                                               # *= non_pad_mask

    # ---- position-wise FFN (two 1x1 convs as matmuls) ----
    y_in = y.astype(x.dtype)
    h = jnp.dot(y_in, w1_ref[...], preferred_element_type=jnp.float32) + b1_ref[...]
    h = jnp.maximum(h, 0.0).astype(x.dtype)                              # ReLU
    z = jnp.dot(h, w2_ref[...], preferred_element_type=jnp.float32) + b2_ref[...]
    z = _layer_norm_f32(z + y, ln2g_ref[...], ln2b_ref[...])             # +residual
    if has_npm:
        z = z * npm_ref[0]                                               # *= non_pad_mask

    out_ref[0] = z.astype(out_ref.dtype)


# ---------------------------------------------------------------------------
# Wrapper
# ---------------------------------------------------------------------------
def encoder_layer(params, enc_input, non_pad_mask=None, slf_attn_mask=None):
    B, L, D = enc_input.shape
    H, d_k, d_v = params["n_head"], params["d_k"], params["d_v"]
    d_inner = params["d_inner"]
    hdk, hdv = H * d_k, H * d_v

    # Fuse Q/K/V projection weights & biases once on the host side.
    wqkv = jnp.concatenate([params["wq"], params["wk"], params["wv"]], axis=1)
    bqkv = jnp.concatenate([params["bq"], params["bk"], params["bv"]], axis=1)

    has_npm = non_pad_mask is not None
    has_mask = slf_attn_mask is not None

    rep2 = lambda b: (0, 0)          # replicated (weights / biases / LN params)
    per_b3 = lambda b: (b, 0, 0)     # per-batch 3-D blocks

    in_specs = [
        pl.BlockSpec((1, L, D), per_b3),               # enc_input
        pl.BlockSpec((D, 2 * hdk + hdv), rep2),        # fused Wqkv
        pl.BlockSpec((1, 2 * hdk + hdv), rep2),        # fused bqkv
        pl.BlockSpec((hdv, D), rep2),                  # Wo (fc)
        pl.BlockSpec((1, D), rep2),                    # bo
        pl.BlockSpec((1, D), rep2),                    # LN1 gamma
        pl.BlockSpec((1, D), rep2),                    # LN1 beta
        pl.BlockSpec((D, d_inner), rep2),              # w_1 (Conv1d k=1, transposed)
        pl.BlockSpec((1, d_inner), rep2),              # b_1
        pl.BlockSpec((d_inner, D), rep2),              # w_2 (Conv1d k=1, transposed)
        pl.BlockSpec((1, D), rep2),                    # b_2
        pl.BlockSpec((1, D), rep2),                    # LN2 gamma
        pl.BlockSpec((1, D), rep2),                    # LN2 beta
    ]
    args = [enc_input, wqkv, bqkv, params["wo"], params["bo"],
            params["ln1_g"], params["ln1_b"],
            params["w1"], params["b1"], params["w2"], params["b2"],
            params["ln2_g"], params["ln2_b"]]

    if has_npm:
        in_specs.append(pl.BlockSpec((1, L, 1), per_b3))
        args.append(non_pad_mask.astype(jnp.float32))
    if has_mask:
        attn_bias = jnp.where(slf_attn_mask, jnp.float32(-1e9), jnp.float32(0.0))
        in_specs.append(pl.BlockSpec((1, L, L), per_b3))
        args.append(attn_bias)

    enc_output, attn_hb = pl.pallas_call(
        functools.partial(encoder_layer_kernel,
                          n_head=H, d_k=d_k, d_v=d_v,
                          has_mask=has_mask, has_npm=has_npm),
        grid=(B,),
        in_specs=in_specs,
        out_specs=[
            pl.BlockSpec((1, L, D), per_b3),
            pl.BlockSpec((H, 1, L, L), lambda b: (0, b, 0, 0)),   # head-major writeback
        ],
        out_shape=(
            jax.ShapeDtypeStruct((B, L, D), enc_input.dtype),
            jax.ShapeDtypeStruct((H, B, L, L), jnp.float32),
        ),
        compiler_params=pltpu.CompilerParams(
            dimension_semantics=("parallel",)),        # batch elems independent (v7x 2-TC)
    )(*args)

    # (H, B, L, L) -> (n_head*B, L, L): contiguous reshape, no transpose pass.
    return enc_output, attn_hb.reshape(H * B, L, L)


# ---------------------------------------------------------------------------
# Pure-JAX reference (PyTorch math, eval mode) for correctness checks.
# ---------------------------------------------------------------------------
def encoder_layer_reference(params, enc_input, non_pad_mask=None, slf_attn_mask=None):
    H, d_k, d_v = params["n_head"], params["d_k"], params["d_v"]
    B, L, D = enc_input.shape
    hp = jax.lax.Precision.HIGHEST
    x = enc_input.astype(jnp.float32)

    def proj(w, b, dh):
        return (jnp.einsum('bld,dk->blk', x, w, precision=hp) + b).reshape(B, L, H, dh)

    q = proj(params["wq"], params["bq"], d_k).transpose(2, 0, 1, 3)   # (H,B,L,dk)
    k = proj(params["wk"], params["bk"], d_k).transpose(2, 0, 1, 3)
    v = proj(params["wv"], params["bv"], d_v).transpose(2, 0, 1, 3)
    s = jnp.einsum('hbld,hbmd->hblm', q, k, precision=hp) / (d_k ** 0.5)
    if slf_attn_mask is not None:
        s = jnp.where(slf_attn_mask[None], jnp.float32(-1e9), s)
    a = jax.nn.softmax(s, axis=-1)                                    # (H,B,L,L)
    ctx = jnp.einsum('hblm,hbmd->hbld', a, v, precision=hp)
    ctx = ctx.transpose(1, 2, 0, 3).reshape(B, L, H * d_v)
    o = jnp.einsum('blk,kd->bld', ctx, params["wo"], precision=hp) + params["bo"]
    y = _layer_norm_f32(o + x, params["ln1_g"], params["ln1_b"])
    if non_pad_mask is not None:
        y = y * non_pad_mask
    h = jnp.maximum(jnp.einsum('bld,di->bli', y, params["w1"], precision=hp)
                    + params["b1"], 0.0)
    z = jnp.einsum('bli,id->bld', h, params["w2"], precision=hp) + params["b2"]
    z = _layer_norm_f32(z + y, params["ln2_g"], params["ln2_b"])
    if non_pad_mask is not None:
        z = z * non_pad_mask
    return z, a.reshape(H * B, L, L)


# ---------------------------------------------------------------------------
# Deterministic synthetic parameter init (shapes from EncoderLayer.__init__)
# ---------------------------------------------------------------------------
def init_params(key, d_model, d_inner, n_head, d_k, d_v):
    ks = jax.random.split(key, 6)
    nrm = lambda k, shape, std: jax.random.normal(k, shape, jnp.float32) * std
    return {
        "n_head": n_head, "d_k": d_k, "d_v": d_v, "d_inner": d_inner,
        # MultiHeadAttention projections (stored (in, out) for right-multiply)
        "wq": nrm(ks[0], (d_model, n_head * d_k), (2.0 / (d_model + d_k)) ** 0.5),
        "bq": jnp.zeros((1, n_head * d_k), jnp.float32),
        "wk": nrm(ks[1], (d_model, n_head * d_k), (2.0 / (d_model + d_k)) ** 0.5),
        "bk": jnp.zeros((1, n_head * d_k), jnp.float32),
        "wv": nrm(ks[2], (d_model, n_head * d_v), (2.0 / (d_model + d_v)) ** 0.5),
        "bv": jnp.zeros((1, n_head * d_v), jnp.float32),
        "wo": nrm(ks[3], (n_head * d_v, d_model), 0.05),
        "bo": jnp.zeros((1, d_model), jnp.float32),
        "ln1_g": jnp.ones((1, d_model), jnp.float32),
        "ln1_b": jnp.zeros((1, d_model), jnp.float32),
        # PositionwiseFeedForward: Conv1d(d_model, d_inner, 1), Conv1d(d_inner, d_model, 1)
        # (weights stored transposed (C_in, C_out); see layout comment above)
        "w1": nrm(ks[4], (d_model, d_inner), 0.05),
        "b1": jnp.zeros((1, d_inner), jnp.float32),
        "w2": nrm(ks[5], (d_inner, d_model), 0.05),
        "b2": jnp.zeros((1, d_model), jnp.float32),
        "ln2_g": jnp.ones((1, d_model), jnp.float32),
        "ln2_b": jnp.zeros((1, d_model), jnp.float32),
    }


if __name__ == "__main__":
    B, L = 2, 8
    d_model, d_inner, n_head, d_k, d_v = 32, 64, 4, 8, 8

    key = jax.random.PRNGKey(0)
    kp, kx = jax.random.split(key)
    params = init_params(kp, d_model, d_inner, n_head, d_k, d_v)

    enc_input = jax.random.normal(kx, (B, L, d_model), jnp.float32)
    # non_pad_mask: (B, L, 1); batch 1 has its last two positions padded.
    non_pad_mask = jnp.ones((B, L, 1), jnp.float32).at[1, L - 2:, 0].set(0.0)
    # Key-padding attention mask (True = masked, as in masked_fill).
    slf_attn_mask = jnp.zeros((B, L, L), bool).at[1, :, L - 2:].set(True)

    TOL = dict(atol=2e-2, rtol=2e-2)   # loose: approx reciprocal + MXU rounding

    # Path 1: no attention mask (bias DMA + add specialized away).
    out1, attn1 = encoder_layer(params, enc_input, non_pad_mask, None)
    jax.block_until_ready((out1, attn1))
    ref_out1, ref_attn1 = encoder_layer_reference(params, enc_input, non_pad_mask, None)
    assert out1.shape == (B, L, d_model) and attn1.shape == (n_head * B, L, L)
    np.testing.assert_allclose(np.asarray(out1), np.asarray(ref_out1), **TOL)
    np.testing.assert_allclose(np.asarray(attn1), np.asarray(ref_attn1), **TOL)

    # Path 2: with the key-padding attention mask.
    out2, attn2 = encoder_layer(params, enc_input, non_pad_mask, slf_attn_mask)
    jax.block_until_ready((out2, attn2))
    ref_out2, ref_attn2 = encoder_layer_reference(params, enc_input, non_pad_mask,
                                                  slf_attn_mask)
    np.testing.assert_allclose(np.asarray(out2), np.asarray(ref_out2), **TOL)
    np.testing.assert_allclose(np.asarray(attn2), np.asarray(ref_attn2), **TOL)
    masked_probs = attn2.reshape(n_head, B, L, L)[:, 1, :, L - 2:]
    assert float(jnp.max(masked_probs)) < 1e-6   # masked keys get ~0 probability

    # Path 3: non_pad_mask=None specialization (mask DMA + multiplies elided).
    out3, attn3 = encoder_layer(params, enc_input, None, None)
    jax.block_until_ready((out3, attn3))
    assert bool(jnp.all(jnp.isfinite(out3))) and bool(jnp.all(jnp.isfinite(attn3)))

    print("KERNEL_OK")
</pallas_src>

<mosaic_0001>
module attributes {stable_mosaic.version = 11 : i64} {
  func.func @encoder_layer_kernel(%arg0: i32, %arg1: memref<1x8x32xf32, #tpu.memory_space<vmem>>, %arg2: memref<32x96xf32, #tpu.memory_space<vmem>>, %arg3: memref<1x96xf32, #tpu.memory_space<vmem>>, %arg4: memref<32x32xf32, #tpu.memory_space<vmem>>, %arg5: memref<1x32xf32, #tpu.memory_space<vmem>>, %arg6: memref<1x32xf32, #tpu.memory_space<vmem>>, %arg7: memref<1x32xf32, #tpu.memory_space<vmem>>, %arg8: memref<32x64xf32, #tpu.memory_space<vmem>>, %arg9: memref<1x64xf32, #tpu.memory_space<vmem>>, %arg10: memref<64x32xf32, #tpu.memory_space<vmem>>, %arg11: memref<1x32xf32, #tpu.memory_space<vmem>>, %arg12: memref<1x32xf32, #tpu.memory_space<vmem>>, %arg13: memref<1x32xf32, #tpu.memory_space<vmem>>, %arg14: memref<1x8x1xf32, #tpu.memory_space<vmem>>, %arg15: memref<1x8x32xf32, #tpu.memory_space<vmem>>, %arg16: memref<4x1x8x8xf32, #tpu.memory_space<vmem>>) attributes {dimension_semantics = [#tpu.dimension_semantics<parallel>], iteration_bounds = array<i64: 2>, scalar_prefetch = 0 : i64, scratch_operands = 0 : i64, tpu.core_type = #tpu.core_type<tc>, window_params = [{transform_indices = @transform_0, window_bounds = array<i64: 1, 8, 32>}, {pipeline_mode = #tpu.pipeline_mode<synchronous>, transform_indices = @transform_1, window_bounds = array<i64: 32, 96>}, {pipeline_mode = #tpu.pipeline_mode<synchronous>, transform_indices = @transform_2, window_bounds = array<i64: 1, 96>}, {pipeline_mode = #tpu.pipeline_mode<synchronous>, transform_indices = @transform_3, window_bounds = array<i64: 32, 32>}, {pipeline_mode = #tpu.pipeline_mode<synchronous>, transform_indices = @transform_4, window_bounds = array<i64: 1, 32>}, {pipeline_mode = #tpu.pipeline_mode<synchronous>, transform_indices = @transform_5, window_bounds = array<i64: 1, 32>}, {pipeline_mode = #tpu.pipeline_mode<synchronous>, transform_indices = @transform_6, window_bounds = array<i64: 1, 32>}, {pipeline_mode = #tpu.pipeline_mode<synchronous>, transform_indices = @transform_7, window_bounds = array<i64: 32, 64>}, {pipeline_mode = #tpu.pipeline_mode<synchronous>, transform_indices = @transform_8, window_bounds = array<i64: 1, 64>}, {pipeline_mode = #tpu.pipeline_mode<synchronous>, transform_indices = @transform_9, window_bounds = array<i64: 64, 32>}, {pipeline_mode = #tpu.pipeline_mode<synchronous>, transform_indices = @transform_10, window_bounds = array<i64: 1, 32>}, {pipeline_mode = #tpu.pipeline_mode<synchronous>, transform_indices = @transform_11, window_bounds = array<i64: 1, 32>}, {pipeline_mode = #tpu.pipeline_mode<synchronous>, transform_indices = @transform_12, window_bounds = array<i64: 1, 32>}, {transform_indices = @transform_13, window_bounds = array<i64: 1, 8, 1>}, {transform_indices = @transform_14, window_bounds = array<i64: 1, 8, 32>}, {transform_indices = @transform_15, window_bounds = array<i64: 4, 1, 8, 8>}]} {
    %c0 = arith.constant 0 : index
    %c0_0 = arith.constant 0 : index
    %c0_1 = arith.constant 0 : index
    %0 = vector.load %arg1[%c0, %c0_0, %c0_1] : memref<1x8x32xf32, #tpu.memory_space<vmem>>, vector<1x8x32xf32>
    %1 = vector.shape_cast %0 : vector<1x8x32xf32> to vector<8x32xf32>
    %c0_2 = arith.constant 0 : index
    %c0_3 = arith.constant 0 : index
    %2 = vector.load %arg2[%c0_2, %c0_3] : memref<32x96xf32, #tpu.memory_space<vmem>>, vector<32x96xf32>
    %cst = arith.constant dense<0.000000e+00> : vector<8x96xf32>
    %3 = tpu.matmul %1, %2, %cst {dimension_numbers = #tpu.dot_dimension_numbers<[1], [0], [0], [1], [0, 0, 1, 1], [], []>} : vector<8x32xf32>, vector<32x96xf32>, vector<8x96xf32> -> vector<8x96xf32>
    %c0_4 = arith.constant 0 : index
    %c0_5 = arith.constant 0 : index
    %4 = vector.load %arg3[%c0_4, %c0_5] : memref<1x96xf32, #tpu.memory_space<vmem>>, vector<1x96xf32>
    %5 = vector.broadcast %4 : vector<1x96xf32> to vector<8x96xf32>
    %6 = arith.addf %3, %5 : vector<8x96xf32>
    %7 = vector.extract_strided_slice %6 {offsets = [0, 0], sizes = [8, 32], strides = [1, 1]} : vector<8x96xf32> to vector<8x32xf32>
    %8 = vector.shape_cast %7 : vector<8x32xf32> to vector<8x4x8xf32>
    %9 = tpu.transpose %8, [1, 0, 2] : vector<8x4x8xf32> -> vector<4x8x8xf32>
    %10 = vector.extract_strided_slice %6 {offsets = [0, 32], sizes = [8, 32], strides = [1, 1]} : vector<8x96xf32> to vector<8x32xf32>
    %11 = vector.shape_cast %10 : vector<8x32xf32> to vector<8x4x8xf32>
    %12 = tpu.transpose %11, [1, 0, 2] : vector<8x4x8xf32> -> vector<4x8x8xf32>
    %13 = vector.extract_strided_slice %6 {offsets = [0, 64], sizes = [8, 32], strides = [1, 1]} : vector<8x96xf32> to vector<8x32xf32>
    %14 = vector.shape_cast %13 : vector<8x32xf32> to vector<8x4x8xf32>
    %15 = tpu.transpose %14, [1, 0, 2] : vector<8x4x8xf32> -> vector<4x8x8xf32>
    "tpu.trace_start"() <{level = 10 : i32, message = "hld,hmd->hlm"}> : () -> ()
    %cst_6 = arith.constant dense<0.000000e+00> : vector<4x8x8xf32>
    %16 = tpu.matmul %9, %12, %cst_6 {dimension_numbers = #tpu.dot_dimension_numbers<[2], [2], [1], [1], [0, 0, 0, 1, 1, 1], [0], [0]>} : vector<4x8x8xf32>, vector<4x8x8xf32>, vector<4x8x8xf32> -> vector<4x8x8xf32>
    "tpu.trace_stop"() : () -> ()
    %cst_7 = arith.constant 0.353553385 : f32
    %17 = vector.broadcast %cst_7 : f32 to vector<4x8x8xf32>
    %18 = arith.mulf %16, %17 : vector<4x8x8xf32>
    %cst_8 = arith.constant dense<0xFF800000> : vector<4x8xf32>
    %19 = vector.multi_reduction <maximumf>, %18, %cst_8 [2] : vector<4x8x8xf32> to vector<4x8xf32>
    %20 = vector.shape_cast %19 : vector<4x8xf32> to vector<4x8x1xf32>
    %21 = vector.broadcast %20 : vector<4x8x1xf32> to vector<4x8x8xf32>
    %22 = arith.subf %18, %21 : vector<4x8x8xf32>
    %23 = math.exp %22 : vector<4x8x8xf32>
    %cst_9 = arith.constant dense<0.000000e+00> : vector<4x8xf32>
    %24 = vector.multi_reduction <add>, %23, %cst_9 [2] : vector<4x8x8xf32> to vector<4x8xf32>
    %25 = vector.shape_cast %24 : vector<4x8xf32> to vector<4x8x1xf32>
    %26 = tpu.reciprocal %25 {approx = true} : vector<4x8x1xf32> -> vector<4x8x1xf32>
    %27 = vector.broadcast %26 : vector<4x8x1xf32> to vector<4x8x8xf32>
    %28 = arith.mulf %23, %27 : vector<4x8x8xf32>
    %29 = vector.shape_cast %28 : vector<4x8x8xf32> to vector<4x1x8x8xf32>
    %c0_10 = arith.constant 0 : index
    %c0_11 = arith.constant 0 : index
    %c0_12 = arith.constant 0 : index
    %c0_13 = arith.constant 0 : index
    %30 = vector.load %arg16[%c0_10, %c0_11, %c0_12, %c0_13] : memref<4x1x8x8xf32, #tpu.memory_space<vmem>>, vector<4x1x8x8xf32>
    tpu.vector_store %arg16[%c0_10, %c0_11, %c0_12, %c0_13], %29 {strides = array<i32>} : memref<4x1x8x8xf32, #tpu.memory_space<vmem>>, vector<4x1x8x8xf32>,
    "tpu.trace_start"() <{level = 10 : i32, message = "hlm,hmd->hld"}> : () -> ()
    %cst_14 = arith.constant dense<0.000000e+00> : vector<4x8x8xf32>
    %31 = tpu.matmul %28, %15, %cst_14 {dimension_numbers = #tpu.dot_dimension_numbers<[2], [1], [1], [2], [0, 0, 0, 1, 1, 2], [0], [0]>} : vector<4x8x8xf32>, vector<4x8x8xf32>, vector<4x8x8xf32> -> vector<4x8x8xf32>
    "tpu.trace_stop"() : () -> ()
    %32 = tpu.transpose %31, [1, 0, 2] : vector<4x8x8xf32> -> vector<8x4x8xf32>
    %33 = vector.shape_cast %32 : vector<8x4x8xf32> to vector<8x32xf32>
    %c0_15 = arith.constant 0 : index
    %c0_16 = arith.constant 0 : index
    %34 = vector.load %arg4[%c0_15, %c0_16] : memref<32x32xf32, #tpu.memory_space<vmem>>, vector<32x32xf32>
    %cst_17 = arith.constant dense<0.000000e+00> : vector<8x32xf32>
    %35 = tpu.matmul %33, %34, %cst_17 {dimension_numbers = #tpu.dot_dimension_numbers<[1], [0], [0], [1], [0, 0, 1, 1], [], []>} : vector<8x32xf32>, vector<32x32xf32>, vector<8x32xf32> -> vector<8x32xf32>
    %c0_18 = arith.constant 0 : index
    %c0_19 = arith.constant 0 : index
    %36 = vector.load %arg5[%c0_18, %c0_19] : memref<1x32xf32, #tpu.memory_space<vmem>>, vector<1x32xf32>
    %37 = vector.broadcast %36 : vector<1x32xf32> to vector<8x32xf32>
    %38 = arith.addf %35, %37 : vector<8x32xf32>
    %39 = arith.addf %38, %1 : vector<8x32xf32>
    %c0_20 = arith.constant 0 : index
    %c0_21 = arith.constant 0 : index
    %40 = vector.load %arg6[%c0_20, %c0_21] : memref<1x32xf32, #tpu.memory_space<vmem>>, vector<1x32xf32>
    %c0_22 = arith.constant 0 : index
    %c0_23 = arith.constant 0 : index
    %41 = vector.load %arg7[%c0_22, %c0_23] : memref<1x32xf32, #tpu.memory_space<vmem>>, vector<1x32xf32>
    %cst_24 = arith.constant dense<0.000000e+00> : vector<8xf32>
    %42 = vector.multi_reduction <add>, %39, %cst_24 [1] : vector<8x32xf32> to vector<8xf32>
    %43 = vector.shape_cast %42 : vector<8xf32> to vector<8x1xf32>
    %cst_25 = arith.constant 3.200000e+01 : f32
    %44 = vector.broadcast %cst_25 : f32 to vector<8x1xf32>
    %45 = arith.divf %43, %44 : vector<8x1xf32>
    %46 = vector.broadcast %45 : vector<8x1xf32> to vector<8x32xf32>
    %47 = arith.subf %39, %46 : vector<8x32xf32>
    %48 = arith.mulf %47, %47 : vector<8x32xf32>
    %cst_26 = arith.constant dense<0.000000e+00> : vector<8xf32>
    %49 = vector.multi_reduction <add>, %48, %cst_26 [1] : vector<8x32xf32> to vector<8xf32>
    %50 = vector.shape_cast %49 : vector<8xf32> to vector<8x1xf32>
    %cst_27 = arith.constant 3.200000e+01 : f32
    %51 = vector.broadcast %cst_27 : f32 to vector<8x1xf32>
    %52 = arith.divf %50, %51 : vector<8x1xf32>
    %53 = vector.broadcast %45 : vector<8x1xf32> to vector<8x32xf32>
    %54 = arith.subf %39, %53 : vector<8x32xf32>
    %cst_28 = arith.constant 9.99999974E-6 : f32
    %55 = vector.broadcast %cst_28 : f32 to vector<8x1xf32>
    %56 = arith.addf %52, %55 : vector<8x1xf32>
    %57 = math.rsqrt %56 : vector<8x1xf32>
    %58 = vector.broadcast %57 : vector<8x1xf32> to vector<8x32xf32>
    %59 = arith.mulf %54, %58 : vector<8x32xf32>
    %60 = vector.broadcast %40 : vector<1x32xf32> to vector<8x32xf32>
    %61 = arith.mulf %59, %60 : vector<8x32xf32>
    %62 = vector.broadcast %41 : vector<1x32xf32> to vector<8x32xf32>
    %63 = arith.addf %61, %62 : vector<8x32xf32>
    %c0_29 = arith.constant 0 : index
    %c0_30 = arith.constant 0 : index
    %c0_31 = arith.constant 0 : index
    %64 = vector.load %arg14[%c0_29, %c0_30, %c0_31] : memref<1x8x1xf32, #tpu.memory_space<vmem>>, vector<1x8x1xf32>
    %65 = vector.shape_cast %64 : vector<1x8x1xf32> to vector<8x1xf32>
    %66 = vector.broadcast %65 : vector<8x1xf32> to vector<8x32xf32>
    %67 = arith.mulf %63, %66 : vector<8x32xf32>
    %c0_32 = arith.constant 0 : index
    %c0_33 = arith.constant 0 : index
    %68 = vector.load %arg8[%c0_32, %c0_33] : memref<32x64xf32, #tpu.memory_space<vmem>>, vector<32x64xf32>
    %cst_34 = arith.constant dense<0.000000e+00> : vector<8x64xf32>
    %69 = tpu.matmul %67, %68, %cst_34 {dimension_numbers = #tpu.dot_dimension_numbers<[1], [0], [0], [1], [0, 0, 1, 1], [], []>} : vector<8x32xf32>, vector<32x64xf32>, vector<8x64xf32> -> vector<8x64xf32>
    %c0_35 = arith.constant 0 : index
    %c0_36 = arith.constant 0 : index
    %70 = vector.load %arg9[%c0_35, %c0_36] : memref<1x64xf32, #tpu.memory_space<vmem>>, vector<1x64xf32>
    %71 = vector.broadcast %70 : vector<1x64xf32> to vector<8x64xf32>
    %72 = arith.addf %69, %71 : vector<8x64xf32>
    %cst_37 = arith.constant 0.000000e+00 : f32
    %73 = vector.broadcast %cst_37 : f32 to vector<8x64xf32>
    %74 = arith.maximumf %72, %73 : vector<8x64xf32>
    %c0_38 = arith.constant 0 : index
    %c0_39 = arith.constant 0 : index
    %75 = vector.load %arg10[%c0_38, %c0_39] : memref<64x32xf32, #tpu.memory_space<vmem>>, vector<64x32xf32>
    %cst_40 = arith.constant dense<0.000000e+00> : vector<8x32xf32>
    %76 = tpu.matmul %74, %75, %cst_40 {dimension_numbers = #tpu.dot_dimension_numbers<[1], [0], [0], [1], [0, 0, 1, 1], [], []>} : vector<8x64xf32>, vector<64x32xf32>, vector<8x32xf32> -> vector<8x32xf32>
    %c0_41 = arith.constant 0 : index
    %c0_42 = arith.constant 0 : index
    %77 = vector.load %arg11[%c0_41, %c0_42] : memref<1x32xf32, #tpu.memory_space<vmem>>, vector<1x32xf32>
    %78 = vector.broadcast %77 : vector<1x32xf32> to vector<8x32xf32>
    %79 = arith.addf %76, %78 : vector<8x32xf32>
    %80 = arith.addf %79, %67 : vector<8x32xf32>
    %c0_43 = arith.constant 0 : index
    %c0_44 = arith.constant 0 : index
    %81 = vector.load %arg12[%c0_43, %c0_44] : memref<1x32xf32, #tpu.memory_space<vmem>>, vector<1x32xf32>
    %c0_45 = arith.constant 0 : index
    %c0_46 = arith.constant 0 : index
    %82 = vector.load %arg13[%c0_45, %c0_46] : memref<1x32xf32, #tpu.memory_space<vmem>>, vector<1x32xf32>
    %cst_47 = arith.constant dense<0.000000e+00> : vector<8xf32>
    %83 = vector.multi_reduction <add>, %80, %cst_47 [1] : vector<8x32xf32> to vector<8xf32>
    %84 = vector.shape_cast %83 : vector<8xf32> to vector<8x1xf32>
    %cst_48 = arith.constant 3.200000e+01 : f32
    %85 = vector.broadcast %cst_48 : f32 to vector<8x1xf32>
    %86 = arith.divf %84, %85 : vector<8x1xf32>
    %87 = vector.broadcast %86 : vector<8x1xf32> to vector<8x32xf32>
    %88 = arith.subf %80, %87 : vector<8x32xf32>
    %89 = arith.mulf %88, %88 : vector<8x32xf32>
    %cst_49 = arith.constant dense<0.000000e+00> : vector<8xf32>
    %90 = vector.multi_reduction <add>, %89, %cst_49 [1] : vector<8x32xf32> to vector<8xf32>
    %91 = vector.shape_cast %90 : vector<8xf32> to vector<8x1xf32>
    %cst_50 = arith.constant 3.200000e+01 : f32
    %92 = vector.broadcast %cst_50 : f32 to vector<8x1xf32>
    %93 = arith.divf %91, %92 : vector<8x1xf32>
    %94 = vector.broadcast %86 : vector<8x1xf32> to vector<8x32xf32>
    %95 = arith.subf %80, %94 : vector<8x32xf32>
    %cst_51 = arith.constant 9.99999974E-6 : f32
    %96 = vector.broadcast %cst_51 : f32 to vector<8x1xf32>
    %97 = arith.addf %93, %96 : vector<8x1xf32>
    %98 = math.rsqrt %97 : vector<8x1xf32>
    %99 = vector.broadcast %98 : vector<8x1xf32> to vector<8x32xf32>
    %100 = arith.mulf %95, %99 : vector<8x32xf32>
    %101 = vector.broadcast %81 : vector<1x32xf32> to vector<8x32xf32>
    %102 = arith.mulf %100, %101 : vector<8x32xf32>
    %103 = vector.broadcast %82 : vector<1x32xf32> to vector<8x32xf32>
    %104 = arith.addf %102, %103 : vector<8x32xf32>
    %c0_52 = arith.constant 0 : index
    %c0_53 = arith.constant 0 : index
    %c0_54 = arith.constant 0 : index
    %105 = vector.load %arg14[%c0_52, %c0_53, %c0_54] : memref<1x8x1xf32, #tpu.memory_space<vmem>>, vector<1x8x1xf32>
    %106 = vector.shape_cast %105 : vector<1x8x1xf32> to vector<8x1xf32>
    %107 = vector.broadcast %106 : vector<8x1xf32> to vector<8x32xf32>
    %108 = arith.mulf %104, %107 : vector<8x32xf32>
    %c0_55 = arith.constant 0 : index
    %c0_56 = arith.constant 0 : index
    %c0_57 = arith.constant 0 : index
    %109 = vector.load %arg15[%c0_55, %c0_56, %c0_57] : memref<1x8x32xf32, #tpu.memory_space<vmem>>, vector<1x8x32xf32>
    %110 = vector.shape_cast %109 : vector<1x8x32xf32> to vector<8x32xf32>
    %111 = vector.shape_cast %108 : vector<8x32xf32> to vector<1x8x32xf32>
    tpu.vector_store %arg15[%c0_55, %c0_56, %c0_57], %111 {strides = array<i32>} : memref<1x8x32xf32, #tpu.memory_space<vmem>>, vector<1x8x32xf32>,
    return
  }
  func.func @transform_0(%arg0: i32) -> (i32, i32, i32) {
    %c0_i32 = arith.constant 0 : i32
    %c0_i32_0 = arith.constant 0 : i32
    %c0_i32_1 = arith.constant 0 : i32
    return %arg0, %c0_i32, %c0_i32_0 : i32, i32, i32
  }
  func.func @transform_1(%arg0: i32) -> (i32, i32) {
    %c0_i32 = arith.constant 0 : i32
    %c0_i32_0 = arith.constant 0 : i32
    %c0_i32_1 = arith.constant 0 : i32
    return %c0_i32, %c0_i32_0 : i32, i32
  }
  func.func @transform_2(%arg0: i32) -> (i32, i32) {
    %c0_i32 = arith.constant 0 : i32
    %c0_i32_0 = arith.constant 0 : i32
    %c0_i32_1 = arith.constant 0 : i32
    return %c0_i32, %c0_i32_0 : i32, i32
  }
  func.func @transform_3(%arg0: i32) -> (i32, i32) {
    %c0_i32 = arith.constant 0 : i32
    %c0_i32_0 = arith.constant 0 : i32
    %c0_i32_1 = arith.constant 0 : i32
    return %c0_i32, %c0_i32_0 : i32, i32
  }
  func.func @transform_4(%arg0: i32) -> (i32, i32) {
    %c0_i32 = arith.constant 0 : i32
    %c0_i32_0 = arith.constant 0 : i32
    %c0_i32_1 = arith.constant 0 : i32
    return %c0_i32, %c0_i32_0 : i32, i32
  }
  func.func @transform_5(%arg0: i32) -> (i32, i32) {
    %c0_i32 = arith.constant 0 : i32
    %c0_i32_0 = arith.constant 0 : i32
    %c0_i32_1 = arith.constant 0 : i32
    return %c0_i32, %c0_i32_0 : i32, i32
  }
  func.func @transform_6(%arg0: i32) -> (i32, i32) {
    %c0_i32 = arith.constant 0 : i32
    %c0_i32_0 = arith.constant 0 : i32
    %c0_i32_1 = arith.constant 0 : i32
    return %c0_i32, %c0_i32_0 : i32, i32
  }
  func.func @transform_7(%arg0: i32) -> (i32, i32) {
    %c0_i32 = arith.constant 0 : i32
    %c0_i32_0 = arith.constant 0 : i32
    %c0_i32_1 = arith.constant 0 : i32
    return %c0_i32, %c0_i32_0 : i32, i32
  }
  func.func @transform_8(%arg0: i32) -> (i32, i32) {
    %c0_i32 = arith.constant 0 : i32
    %c0_i32_0 = arith.constant 0 : i32
    %c0_i32_1 = arith.constant 0 : i32
    return %c0_i32, %c0_i32_0 : i32, i32
  }
  func.func @transform_9(%arg0: i32) -> (i32, i32) {
    %c0_i32 = arith.constant 0 : i32
    %c0_i32_0 = arith.constant 0 : i32
    %c0_i32_1 = arith.constant 0 : i32
    return %c0_i32, %c0_i32_0 : i32, i32
  }
  func.func @transform_10(%arg0: i32) -> (i32, i32) {
    %c0_i32 = arith.constant 0 : i32
    %c0_i32_0 = arith.constant 0 : i32
    %c0_i32_1 = arith.constant 0 : i32
    return %c0_i32, %c0_i32_0 : i32, i32
  }
  func.func @transform_11(%arg0: i32) -> (i32, i32) {
    %c0_i32 = arith.constant 0 : i32
    %c0_i32_0 = arith.constant 0 : i32
    %c0_i32_1 = arith.constant 0 : i32
    return %c0_i32, %c0_i32_0 : i32, i32
  }
  func.func @transform_12(%arg0: i32) -> (i32, i32) {
    %c0_i32 = arith.constant 0 : i32
    %c0_i32_0 = arith.constant 0 : i32
    %c0_i32_1 = arith.constant 0 : i32
    return %c0_i32, %c0_i32_0 : i32, i32
  }
  func.func @transform_13(%arg0: i32) -> (i32, i32, i32) {
    %c0_i32 = arith.constant 0 : i32
    %c0_i32_0 = arith.constant 0 : i32
    %c0_i32_1 = arith.constant 0 : i32
    return %arg0, %c0_i32, %c0_i32_0 : i32, i32, i32
  }
  func.func @transform_14(%arg0: i32) -> (i32, i32, i32) {
    %c0_i32 = arith.constant 0 : i32
    %c0_i32_0 = arith.constant 0 : i32
    %c0_i32_1 = arith.constant 0 : i32
    return %arg0, %c0_i32, %c0_i32_0 : i32, i32, i32
  }
  func.func @transform_15(%arg0: i32) -> (i32, i32, i32, i32) {
    %c0_i32 = arith.constant 0 : i32
    %c0_i32_0 = arith.constant 0 : i32
    %c0_i32_1 = arith.constant 0 : i32
    %c0_i32_2 = arith.constant 0 : i32
    return %c0_i32, %arg0, %c0_i32_0, %c0_i32_1 : i32, i32, i32, i32
  }
}

</mosaic_0001>

<bundles_post_ra>
// kernel: tpu_custom_call.1
= control target key start
LH: loop header
LB: loop body
LE: loop exit
PB: predicated region body
PF: predicated region fallthrough
CT: control target
= control target key end

     0   :  { %s3512_s0 = inlined_call_operand.vmem [shape: f32[2,8,32], index: 0, kind: input, shape index: {}]   ;;  %s3513_s1 = inlined_call_operand.vmem [shape: f32[32,96], index: 1, kind: input, shape index: {}]   ;;  %s3514_s2 = inlined_call_operand.vmem [shape: f32[1,96], index: 2, kind: input, shape index: {}]   ;;  %s3515_s3 = inlined_call_operand.vmem [shape: f32[32,32], index: 3, kind: input, shape index: {}]   ;;  %s3516_s4 = inlined_call_operand.vmem [shape: f32[1,32], index: 4, kind: input, shape index: {}]   ;;  %s3517_s5 = inlined_call_operand.hbm [shape: f32[1,32], index: 5, kind: input, shape index: {}]   ;;  %s3518_s6 = inlined_call_operand.hbm [shape: f32[1,32], index: 6, kind: input, shape index: {}]   ;;  %s3519_s7 = inlined_call_operand.vmem [shape: f32[32,64], index: 7, kind: input, shape index: {}]   ;;  %s3520_s8 = inlined_call_operand.hbm [shape: f32[1,64], index: 8, kind: input, shape index: {}]   ;;  %s3521_s9 = inlined_call_operand.vmem [shape: f32[64,32], index: 9, kind: input, shape index: {}]   ;;  %s3522_s10 = inlined_call_operand.vmem [shape: f32[1,32], index: 10, kind: input, shape index: {}]   ;;  %s3523_s11 = inlined_call_operand.vmem [shape: f32[1,32], index: 11, kind: input, shape index: {}]   ;;  %s3524_s12 = inlined_call_operand.vmem [shape: f32[1,32], index: 12, kind: input, shape index: {}]   ;;  %s3525_s13 = inlined_call_operand.vmem [shape: f32[2,8,1], index: 13, kind: input, shape index: {}]   ;;  %s3526_s14 = inlined_call_operand.hbm [shape: f32[2,8,32], index: 14, kind: output, shape index: {0}]   ;;  %s3527_s15 = inlined_call_operand.hbm [shape: f32[4,2,8,8], index: 15, kind: output, shape index: {1}]  }
   0x1   :  { %3539 = sst [smem:[#allocation21_spill]] %s3523_s11 }
   0x2   :  { %3540 = sst [smem:[#allocation22_spill]] %s3524_s12 }
   0x3   :  { %3541 = sst [smem:[#allocation23_spill]] %s3526_s14 }
   0x4   :  { %21 = vsyncpa [#allocation3], 0 }
   0x5   :  { %22 = vsyncpa [#allocation6], 0 }
   0x6   :  { %23 = vsyncpa [#allocation4], 0 }
   0x7   :  { %25 = vsyncpa [#allocation4 + $0x1], 0 }
   0x8   :  { %26 = vsyncpa [#allocation10], 0 }
   0x9   :  { %28 = vsyncpa [#allocation10 + $0x1], 0  ;;  %s2997_s18 = smov 0   ;;  %s2999_s19 = smov 0  }
   0xa   :  { %s3001_s20 = smov 0   ;;  %s3003_s21 = smov 0  }
   0xb LB: > { %3542 = sst [smem:[#allocation15_spill]] %s2882_s18  ;;  %s3018_s22 = sadd.s32 4294967295, %s2894_s21   ;;  %s2894_s21 = sphi %s3003_s21, %s3567_s21   ;;  %s2890_s20 = sphi %s3001_s20, %s3569_s20   ;;  %s2886_s19 = sphi %s2999_s19, %s3571_s19   ;;  %s2882_s18 = sphi %s2997_s18, %s3570_s18  }
   0xc   : > { %3543 = sst [smem:[#allocation16_spill]] %s2890_s20  ;;  %s2382_s23 = sadd.s32 4294967294, %s2894_s21  }
   0xd   : > { %3544 = sst [smem:[#allocation17_spill]] %s2894_s21  ;;  %s3022_s24 = sadd.s32 1, %s2894_s21  }
   0xe   : > { %3545 = sst [smem:[#allocation18_spill]] %s3022_s24  ;;  %s345_s25 = sadd.s32 1, %s2890_s20 }
   0xf   : > { %s342_s26 = ssub.s32 %s2894_s21, %s3022_s24  ;;  %p355_p0 = scmp.ne.s32.totalorder %s2890_s20, %s2886_s19 }
  0x10   : > { %p343_p1 = scmp.eq.s32.totalorder %s342_s26, 0  ;;  %p356_p2 = scmp.eq.s32.totalorder %s3018_s22, 1 }
  0x11   : > { %p361_p3 = scmp.ne.s32.totalorder %s2886_s19, %s2882_s18  ;;  %p362_p4 = scmp.eq.s32.totalorder %s2382_s23, 1 }
  0x12   : > { %s3033_s27 = scalar_select %p343_p1, %s2890_s20, %s345_s25  }
  0x13   : > { %p3035_p5 = por %p356_p2, %p355_p0  ;;  %p3039_p6 = por %p362_p4, %p361_p3 }
  0x14   : > { %3546 = sst [smem:[#allocation19_spill]] %s3033_s27  ;;  %p2383_p7 = scmp.ge.s32.totalorder %s2894_s21, 1 }
  0x15   : > { %s3547_s28 = scalar_select %p3035_p5, 1, 0 }
  0x16   : > { %s3548_s29 = scalar_select %p3039_p6, 1, 0 }
  0x17   : > { %p395_p8 = scmp.lt.s32.totalorder %s2894_s21, 3  ;;  %p3535_p9 = scmp.eq.s32.totalorder %s3018_s22, 0 }
  0x18   : > { %3549 = sst [smem:[#allocation20_spill]] %s3548_s29  ;;  %s2896_s16 = smov [#allocation5]  }
  0x19   : > { %p3046_p10 = pnand %p2383_p7, %p395_p8  ;;  %s431_s17 = sshll.u32 %s2896_s16, 4  ;;  %s432_s17 = int_to_ptr.vmem [resolvable:$true] %s431_s17 }
  0x1a   : > { %s2897_s23 = smov [#allocation2]   ;;  %s2898_s27 = smov [#allocation7]  }
  0x1b   : > { %s3550_s30 = scalar_select %p3046_p10, 1, 0 }
  0x1c   : > { %p2612_p11 = pneg %p3046_p10  ;;  %s420_s25 = sshll.u32 %s2897_s23, 4  ;;  %s3058_s25 = int_to_ptr.vmem [resolvable:$true] %s420_s25 }
  0x1d   : > { %s445_s20 = sshll.u32 %s2898_s27, 4  ;;  %s2708_s16 = scalar_lea.hbm %s3518_s6, 16  ;;  %s3060_s20 = int_to_ptr.vmem [resolvable:$true] %s445_s20 }
  0x1e   : > { %p3054_p12 = pnand %p3535_p9, %p2612_p11  ;;  %p2709_p13 = scmp.ne.s32.totalorder %s3518_s6, %s2708_s16 }
  0x1f   : > { %p2715_p3 = scmp.lt.u32.totalorder %s2708_s16, %s3518_s6 }
  0x20   : > { %p3070_p0 = pneg %p3054_p12 }
  0x22   : > { %p2711_p1 = pnand %p3070_p0, %p2709_p13 }
  0x24   : > { %p2712_p2 = pneg %p2711_p1 }
  0x26   : > { %p2717_p4 = pnand %p2715_p3, %p2712_p2 }
  0x28   : > { %2720 = shalt.err (!%p2717_p4)
}
  0x29   : > { %s2721_s24 = scalar_lea.vmem %s432_s17, 16  ;;  %s2728_s18 = scalar_lea.vmem %s432_s17, 32 }
  0x2a   : > { %p2722_p7 = scmp.ne.s32.totalorder %s432_s17, %s2721_s24  ;;  %p2729_p9 = scmp.lt.s32.totalorder %s432_s17, %s432_s17 }
  0x2b   : > { %p2730_p6 = scmp.lt.s32.totalorder %s2728_s18, %s2721_s24 }
  0x2c   : > { %p2724_p8 = pnand %p2722_p7, %p3070_p0 }
  0x2d   : > { %p2731_p5 = por %p2730_p6, %p2729_p9 }
  0x2e   : > { %p2725_p11 = pneg %p2724_p8 }
  0x30   : > { %p2732_p10 = pnand %p2731_p5, %p2725_p11 }
  0x32   : > { %2735 = shalt.err (!%p2732_p10)
}
  0x33   : > { %2618 = dma.hbm_to_vmem [thread:$0]  (!%p3054_p12), %s3518_s6, 16, %s432_s17, [#allocation6]  }
  0x34   : > { %s2736_s27 = scalar_lea.hbm %s3517_s5, 16 }
  0x35   : > { %p2737_p13 = scmp.ne.s32.totalorder %s3517_s5, %s2736_s27  ;;  %p2743_p5 = scmp.lt.u32.totalorder %s2736_s27, %s3517_s5 }
  0x37   : > { %p2739_p1 = pnand %p2737_p13, %p3070_p0 }
  0x39   : > { %p2740_p6 = pneg %p2739_p1 }
  0x3b   : > { %p2745_p9 = pnand %p2743_p5, %p2740_p6 }
  0x3d   : > { %2748 = shalt.err (!%p2745_p9)
}
  0x3e   : > { %s2749_s17 = scalar_lea.vmem %s3058_s25, 16  ;;  %s2756_s11 = scalar_lea.vmem %s3058_s25, 32 }
  0x3f   : > { %p2750_p10 = scmp.ne.s32.totalorder %s3058_s25, %s2749_s17  ;;  %p2757_p4 = scmp.lt.s32.totalorder %s3058_s25, %s3058_s25 }
  0x40   : > { %p2758_p7 = scmp.lt.s32.totalorder %s2756_s11, %s2749_s17 }
  0x41   : > { %p2752_p2 = pnand %p2750_p10, %p3070_p0 }
  0x42   : > { %p2759_p8 = por %p2758_p7, %p2757_p4 }
  0x43   : > { %p2753_p3 = pneg %p2752_p2 }
  0x45   : > { %p2760_p11 = pnand %p2759_p8, %p2753_p3 }
  0x47   : > { %2763 = shalt.err (!%p2760_p11)
}
  0x48   : > { %2615 = dma.hbm_to_vmem [thread:$0]  (!%p3054_p12), %s3517_s5, 16, %s3058_s25, [#allocation3]  }
  0x49   : > { %s2764_s16 = scalar_lea.hbm %s3520_s8, 16 }
  0x4a   : > { %p2765_p13 = scmp.ne.s32.totalorder %s3520_s8, %s2764_s16  ;;  %p2771_p5 = scmp.lt.u32.totalorder %s2764_s16, %s3520_s8 }
  0x4c   : > { %p2767_p1 = pnand %p2765_p13, %p3070_p0 }
  0x4e   : > { %p2768_p6 = pneg %p2767_p1 }
  0x50   : > { %p2773_p9 = pnand %p2771_p5, %p2768_p6 }
  0x52   : > { %2776 = shalt.err (!%p2773_p9)
}
  0x53   : > { %s2777_s25 = scalar_lea.vmem %s3060_s20, 16  ;;  %s2784_s11 = scalar_lea.vmem %s3060_s20, 32 }
  0x54   : > { %p2778_p10 = scmp.ne.s32.totalorder %s3060_s20, %s2777_s25  ;;  %p2785_p4 = scmp.lt.s32.totalorder %s3060_s20, %s3060_s20 }
  0x55   : > { %p2786_p7 = scmp.lt.s32.totalorder %s2784_s11, %s2777_s25 }
  0x56   : > { %p2780_p2 = pnand %p2778_p10, %p3070_p0 }
  0x57   : > { %p2787_p8 = por %p2786_p7, %p2785_p4 }
  0x58   : > { %p2781_p3 = pneg %p2780_p2 }
  0x5a   : > { %p2788_p11 = pnand %p2787_p8, %p2781_p3 }
  0x5c   : > { %2791 = shalt.err (!%p2788_p11)
}
  0x5d   : > { %2621 = dma.hbm_to_vmem [thread:$0]  (!%p3054_p12), %s3520_s8, 16, %s3060_s20, [#allocation6]  }
  0x5e   : > { %p3553_p13 = scmp.ne.s32.totalorder %s3550_s30, 0 }
  0x5f   : > { %p3554_p0 = scmp.eq.s32.totalorder (!%p3553_p13), %s3018_s22, 0 }
  0x60   : > { %484 = sbr.rel (%p3553_p13) target bundleno = 2780 (0xadc), region = 76 }
  0x67   : > { %2865 = dma.done.wait (%p3554_p0), [#allocation3], 16   ;;  %p3555_p1 = pmov %p3554_p0 }
  0x68   : > { %p3556_p6 = pmov %p3554_p0 }
  0x69   : > { %2867 = vsyncadd (%p3555_p1), [#allocation3], 4294967280 }
  0x6a   : > { %2869 = dma.done.wait (%p3556_p6), [#allocation6], 32   ;;  %p3557_p5 = pmov %p3554_p0 }
  0x6b   : > { %p548_p9 = scmp.lt.s32.totalorder %s3018_s22, 1  ;;  %v2899_v0 = vmov 0.0|0.0   ;;  %vm2900_vm0 = vmmov 0   ;;  %v2901_v1 = vmov 0.0   ;;  %v557_v2 = vld [vmem:[%s3513_s1] sm:$0xff]  ;;  %v558_v3 = vld [vmem:[%s3513_s1 + $0x8] sm:$0xff]  ;;  %v657_v18 = vlaneseq }
  0x6c   : > { %2871 = vsyncadd (%p3557_p5), [#allocation6], 4294967264  ;;  %2566 = vmatprep.subr.bf16.mxu1 %v2899_v0  ;;  %2482 = vmatprep.mubr.msk.f32.mxu1 %vm2900_vm0, %v2901_v1  ;;  %v559_v4 = vld [vmem:[%s3513_s1 + $0x10] sm:$0xff]  ;;  %v2567_v5 = vpack.c.bf16 %v558_v3, %v557_v2  ;;  %v560_v6 = vld [vmem:[%s3513_s1 + $0x18] sm:$0xff]  ;;  %vm568_vm1 = vcmask 261120   ;;  %s2902_s30 = smov 104  }
  0x6d   : > { %2495 = vmatprep.subr.mxu0 %v2901_v1  ;;  %2497 = vmatprep.mubr.msk.f32.mxu0 %vm2900_vm0, %v2901_v1  ;;  %s3152_s20 = scalar_select %p548_p9, %s3018_s22, 1  ;;  %v2570_v7 = vpack.c.bf16 %v560_v6, %v559_v4  ;;  %v2396_v9 = vld [vmem:[%s3514_s2] ss:$0 sm:$0xff]  ;;  %v2906_v16 = vmov 1983009808   ;;  %v658_v20 = vshrl.u32 %v657_v18, 7 }
  0x6e   : > { %2568 = vmatpush3.bf16.msra.mxu1 %v2567_v5  ;;  %s2903_s26 = smov 120   ;;  %s2904_s23 = smov 96   ;;  %v655_v17 = vunpack.c.l.s4 %v2906_v16  ;;  %v2907_v21 = vmov 1934713408   ;;  %vm1084_vm2 = vcmask 64512   ;;  %vm1882_vm3 = vcmask 130048  }
  0x6f   : > { %s2394_s18 = sshll.u32 %s3152_s20, 3  ;;  %2569 = vmatprep.subr.bf16.mxu1 %v2899_v0  ;;  %s2905_s29 = smov 112   ;;  %v687_v22 = vunpack.c.l.s4 %v2907_v21  ;;  %vm1884_vm4 = vcmask 195584   ;;  %vm2108_vm5 = vcmask 523264  }
  0x70   : > { %s551_s11 = scalar_lea.vmem %s3512_s0, %s2394_s18  ;;  %v656_v19 = vunpack.c.0.s8 %v655_v17  ;;  %s2908_s14 = smov 64  }
  0x71   : > { %v3173_v8 = vld [vmem:[%s551_s11] sm:$0xff]  ;;  %v688_v28 = vunpack.c.0.s8 %v687_v22  ;;  %s3279_s16 = sand.u32 1, %s2886_s19   ;;  %s555_s21 = scalar_lea.vmem %s3525_s13, %s2394_s18 }
  0x72   : > { %2571 = vmatpush3.bf16.msra.mxu1 %v2570_v7  ;;  %v3202_v25 = vsub.s32 %v656_v19, %v658_v20  ;;  %s2393_s27 = sshll.u32 %s3279_s16, 5  ;;  %s3538_s20 = sshll.u32 %s3018_s22, 7 }
  0x73   : > { %2485 = vmatprep.subr.mxu1 %v2901_v1  ;;  %v3212_v33 = vsub.s32 %v688_v28, %v658_v20  ;;  %s3282_s24 = scalar_lea.vmem [#allocation9], %s2393_s27  ;;  %s2911_s27 = smov 24  }
  0x74   : > { %s2220_s17 = scalar_lea.sflag [#allocation10], %s3279_s16  ;;  %p3558_p10 = scmp.ne.s32.totalorder %s3547_s28, 0 }
  0x75   : > { %2483 = vmatmul.mubr.msk.f32.vlgmr.msra.gmra.mrb[0].mxu1 %vm568_vm1, %v3173_v8  ;;  %s2913_s11 = smov [#allocation9]  }
  0x76   : > { %2487 = vmatprep.mubr.msk.f32.mxu1 %vm2900_vm0, %v2901_v1  ;;  %s2796_s12 = sshll.u32 %s2913_s11, 4  ;;  %s2797_s12 = int_to_ptr.vmem [resolvable:$false] %s2796_s12 }
 0x148   : > { %v638_v10 = vpop.f32.mrb[0].mxu1 }
 0x149   : > { %v3183_v11 = vadd.f32 %v2396_v9, %v638_v10  ;;  %v2484_v12 = vpop.f32.mrb[1].mxu1 }
 0x14b   : > { %649 = vrot.lane.b32.xlu1 %v3183_v11, %s2902_s30  ;;  %643 = vrot.lane.b32.xlu0 %v3183_v11, %s2903_s26 }
 0x14f   : > { %788 = vrot.lane.b32.xlu1 %v3183_v11, %s2904_s23  ;;  %646 = vrot.lane.b32.xlu0 %v3183_v11, %s2905_s29  ;;  %s2909_s29 = smov 16  }
 0x1bd   : > { %v3189_v13 = vpop.permute.xlu0 %643  ;;  %v3192_v14 = vpop.permute.xlu1 %649 }
 0x1be   : > { %790 = vrot.lane.b32.xlu0 %v3189_v13, %s2904_s23  ;;  %v668_v26 = vcombine.low %v3189_v13, %v3192_v14  ;;  %v669_v27 = vcombine.high %v3189_v13, %v3192_v14 }
 0x1c0   : > { %v676_v31 = vrot.slane %v668_v26, %v3202_v25  ;;  %v683_v32 = vrot.slane %v669_v27, %v3202_v25 }
 0x1c1   : > { %v3194_v15 = vpop.permute.xlu0 %646  ;;  %v789_v34 = vpop.permute.xlu1 %788 }
 0x1c2   : > { %794 = vrot.lane.b32.xlu0 %v3192_v14, %s2904_s23  ;;  %792 = vrot.lane.b32.xlu1 %v3194_v15, %s2904_s23  ;;  %v652_v23 = vcombine.low %v3183_v11, %v3194_v15  ;;  %v653_v24 = vcombine.high %v3183_v11, %v3194_v15 }
 0x1c4   : > { %v660_v29 = vrot.slane %v652_v23, %v3202_v25  ;;  %v667_v30 = vrot.slane %v653_v24, %v3202_v25 }
 0x1c6   : > { %v684_v35 = vcombine.low %v660_v29, %v676_v31  ;;  %v685_v36 = vcombine.high %v660_v29, %v676_v31  ;;  %v700_v37 = vcombine.low %v667_v30, %v683_v32  ;;  %v701_v38 = vcombine.high %v667_v30, %v683_v32 }
 0x1c8   : > { %v692_v40 = vrot.slane %v684_v35, %v3212_v33  ;;  %v699_v41 = vrot.slane %v685_v36, %v3212_v33  ;;  %v708_v42 = vrot.slane %v700_v37, %v3212_v33  ;;  %v715_v43 = vrot.slane %v701_v38, %v3212_v33 }
 0x1ca   : > { %v720_v54 = vcombine.low %v692_v40, %v699_v41  ;;  %v2398_v55 = vcombine.high %v692_v40, %v699_v41  ;;  %v736_v56 = vcombine.low %v708_v42, %v715_v43  ;;  %v2399_v57 = vcombine.high %v708_v42, %v715_v43 }
 0x1cc   : > { %v727_v4 = vrot.slane %v720_v54, %v3202_v25  ;;  %v735_v5 = vrot.slane %v2398_v55, %v3202_v25  ;;  %v743_v6 = vrot.slane %v736_v56, %v3202_v25  ;;  %v751_v7 = vrot.slane %v2399_v57, %v3202_v25 }
 0x1ce   : > { %v752_v21 = vcombine.low %v727_v4, %v735_v5  ;;  %v768_v22 = vcombine.low %v743_v6, %v751_v7  ;;  %v753_v23 = vcombine.high %v727_v4, %v735_v5  ;;  %v769_v24 = vcombine.high %v743_v6, %v751_v7 }
 0x1d0   : > { %v760_v35 = vrot.slane %v752_v21, %v3212_v33  ;;  %v776_v36 = vrot.slane %v768_v22, %v3212_v33  ;;  %v767_v37 = vrot.slane %v753_v23, %v3212_v33  ;;  %v783_v38 = vrot.slane %v769_v24, %v3212_v33 }
 0x1d2   : > { %v784_v41 = vcombine.low %v760_v35, %v776_v36  ;;  %v786_v42 = vcombine.low %v767_v37, %v783_v38 }
 0x230   : > { %v791_v39 = vpop.permute.xlu0 %790 }
 0x234   : > { %v793_v44 = vpop.permute.xlu1 %792  ;;  %v795_v45 = vpop.permute.xlu0 %794 }
 0x235   : > { %v800_v46 = vcombine.low %v789_v34, %v793_v44  ;;  %v801_v47 = vcombine.high %v789_v34, %v793_v44  ;;  %v816_v48 = vcombine.low %v791_v39, %v795_v45  ;;  %v817_v49 = vcombine.high %v791_v39, %v795_v45 }
 0x236   : > { %v785_v44 = vcombine.high %v760_v35, %v776_v36 }
 0x237   : > { %v808_v50 = vrot.slane %v800_v46, %v3202_v25  ;;  %v815_v51 = vrot.slane %v801_v47, %v3202_v25  ;;  %v824_v52 = vrot.slane %v816_v48, %v3202_v25  ;;  %v831_v53 = vrot.slane %v817_v49, %v3202_v25 }
 0x238   : > { %v787_v46 = vcombine.high %v767_v37, %v783_v38 }
 0x239   : > { %v832_v58 = vcombine.low %v808_v50, %v824_v52  ;;  %v833_v59 = vcombine.high %v808_v50, %v824_v52  ;;  %v848_v60 = vcombine.low %v815_v51, %v831_v53  ;;  %v849_v61 = vcombine.high %v815_v51, %v831_v53 }
 0x23b   : > { %v840_v62 = vrot.slane %v832_v58, %v3212_v33  ;;  %v847_v63 = vrot.slane %v833_v59, %v3212_v33  ;;  %v856_v2 = vrot.slane %v848_v60, %v3212_v33  ;;  %v863_v3 = vrot.slane %v849_v61, %v3212_v33 }
 0x23d   : > { %v868_v9 = vcombine.low %v840_v62, %v847_v63  ;;  %v2400_v10 = vcombine.high %v840_v62, %v847_v63  ;;  %v884_v12 = vcombine.low %v856_v2, %v863_v3  ;;  %v2401_v16 = vcombine.high %v856_v2, %v863_v3 }
 0x23f   : > { %v875_v17 = vrot.slane %v868_v9, %v3202_v25  ;;  %v883_v18 = vrot.slane %v2400_v10, %v3202_v25  ;;  %v891_v19 = vrot.slane %v884_v12, %v3202_v25  ;;  %v899_v20 = vrot.slane %v2401_v16, %v3202_v25 }
 0x241   : > { %v900_v26 = vcombine.low %v875_v17, %v883_v18  ;;  %v916_v27 = vcombine.low %v891_v19, %v899_v20  ;;  %v901_v28 = vcombine.high %v875_v17, %v883_v18  ;;  %v917_v29 = vcombine.high %v891_v19, %v899_v20 }
 0x243   : > { %v908_v30 = vrot.slane %v900_v26, %v3212_v33  ;;  %v924_v31 = vrot.slane %v916_v27, %v3212_v33  ;;  %v915_v32 = vrot.slane %v901_v28, %v3212_v33  ;;  %v931_v34 = vrot.slane %v917_v29, %v3212_v33 }
 0x245   : > { %v932_v39 = vcombine.low %v908_v30, %v924_v31  ;;  %v934_v40 = vcombine.low %v915_v32, %v931_v34  ;;  %v933_v43 = vcombine.high %v908_v30, %v924_v31  ;;  %v935_v45 = vcombine.high %v915_v32, %v931_v34 }
 0x247   : > { %2486 = vmatpush3.xpose.msk.msra.mxu1 %vm1084_vm2, %v932_v39  ;;  %2496 = vmatpush3.xpose.msk.msra.mxu0 %vm1084_vm2, %v934_v40 }
 0x248   : > { %2490 = vmatprep.subr.mxu1 %v2901_v1  ;;  %2505 = vmatprep.subr.mxu0 %v2901_v1 }
 0x24a   : > { %2488 = vmatmul.mubr.msk.f32.vlgmr.msra.gmra.mrb[2].mxu1 %vm1084_vm2, %v784_v41  ;;  %2498 = vmatmul.mubr.msk.f32.vlgmr.msra.gmra.mrb[0].mxu0 %vm1084_vm2, %v786_v42 }
 0x24b   : > { %2491 = vmatpush3.xpose.msk.msra.mxu1 %vm1084_vm2, %v933_v43  ;;  %2492 = vmatprep.mubr.msk.f32.mxu1 %vm2900_vm0, %v2901_v1 }
 0x24c   : > { %2500 = vmatprep.subr.mxu1 %v2901_v1  ;;  %2507 = vmatprep.mubr.msk.f32.mxu0 %vm2900_vm0, %v2901_v1 }
 0x24e   : > { %2493 = vmatmul.mubr.msk.f32.vlgmr.msra.gmra.mrb[4].mxu1 %vm1084_vm2, %v785_v44 }
 0x24f   : > { %2501 = vmatpush3.xpose.msk.msra.mxu1 %vm1084_vm2, %v935_v45  ;;  %2502 = vmatprep.mubr.msk.f32.mxu1 %vm2900_vm0, %v2901_v1 }
 0x250   : > { %2510 = vmatprep.subr.mxu1 %v2901_v1 }
 0x252   : > { %2503 = vmatmul.mubr.msk.f32.vlgmr.msra.gmra.mrb[6].mxu1 %vm1084_vm2, %v787_v46 }
 0x253   : > { %2512 = vmatprep.mubr.msk.f32.mxu1 %vm2900_vm0, %v2901_v1 }
 0x31d   : > { %v1157_v47 = vpop.f32.mrb[2].mxu1  ;;  %v1309_v48 = vpop.f32.mrb[0].mxu0 }
 0x31e   : > { %v1389_v49 = vmul.f32 0.35355338, %v1157_v47  ;;  %v2489_v50 = vpop.f32.mrb[3].mxu1  ;;  %v2499_v51 = vpop.f32.mrb[1].mxu0  ;;  %v1391_v56 = vmul.f32 0.35355338, %v1309_v48 }
 0x320   : > { %v1393_v52 = vsel %vm1084_vm2, %v1389_v49, -inf  ;;  %v1399_v61 = vsel %vm1084_vm2, %v1391_v56, -inf }
 0x321   : > { %1394 = vmax.xlane.f32.xlu1 %v1393_v52  ;;  %v1233_v53 = vpop.f32.mrb[4].mxu1 }
 0x322   : > { %v1390_v54 = vmul.f32 0.35355338, %v1233_v53  ;;  %v2494_v55 = vpop.f32.mrb[5].mxu1 }
 0x324   : > { %v1396_v57 = vsel %vm1084_vm2, %v1390_v54, -inf }
 0x325   : > { %1397 = vmax.xlane.f32.xlu0 %v1396_v57  ;;  %v1385_v58 = vpop.f32.mrb[6].mxu1 }
 0x326   : > { %v1392_v59 = vmul.f32 0.35355338, %v1385_v58  ;;  %v2504_v60 = vpop.f32.mrb[7].mxu1 }
 0x328   : > { %v1402_v62 = vsel %vm1084_vm2, %v1392_v59, -inf }
 0x329   : > { %1400 = vmax.xlane.f32.xlu0 %v1399_v61  ;;  %1403 = vmax.xlane.f32.xlu1 %v1402_v62 }
 0x33a   : > { %938 = vrot.lane.b32.xlu1 %v3189_v13, %s2908_s14 }
 0x33f   : > { %936 = vrot.lane.b32.xlu0 %v3183_v11, %s2908_s14 }
 0x3ae   : > { %v1395_v63 = vpop.xlane.xlu1 %1394 }
 0x3af   : > { %v1405_v2 = vsub.f32 %v1389_v49, %v1395_v63 }
 0x3b1   : > { %v1409_v3 = vmul.f32 1.442695, %v1405_v2 }
 0x3b2   : > { %v1398_v4 = vpop.xlane.xlu0 %1397 }
 0x3b3   : > { %2688 = vpow2.f32 %v1409_v3  ;;  %v1406_v5 = vsub.f32 %v1390_v54, %v1398_v4 }
 0x3b5   : > { %v1411_v6 = vmul.f32 1.442695, %v1406_v5 }
 0x3b6   : > { %v1401_v7 = vpop.xlane.xlu0 %1400  ;;  %v1404_v9 = vpop.xlane.xlu1 %1403 }
 0x3b7   : > { %2690 = vpow2.f32 %v1411_v6  ;;  %v1407_v10 = vsub.f32 %v1391_v56, %v1401_v7  ;;  %v1408_v12 = vsub.f32 %v1392_v59, %v1404_v9 }
 0x3b9   : > { %v1413_v16 = vmul.f32 1.442695, %v1407_v10  ;;  %v1415_v17 = vmul.f32 1.442695, %v1408_v12 }
 0x3ba   : > { %v937_v24 = vpop.permute.xlu0 %936  ;;  %v939_v26 = vpop.permute.xlu1 %938 }
 0x3bb   : > { %2692 = vpow2.f32 %v1413_v16 }
 0x3bc   : > { %2694 = vpow2.f32 %v1415_v17 }
 0x3bd   : > { %v2689_v13 = vpop.eup %2688 }
 0x3be   : > { %v1417_v18 = vsel %vm1084_vm2, %v2689_v13, 0.0 }
 0x3bf   : > { %1418 = vadd.xlane.f32.xlu0 %v1417_v18  ;;  %v1886_v18 = vld [vmem:[%s3515_s3] sm:$0xff] }
 0x3c1   : > { %v2691_v11 = vpop.eup %2690 }
 0x3c2   : > { %v1420_v19 = vsel %vm1084_vm2, %v2691_v11, 0.0 }
 0x3c3   : > { %1421 = vadd.xlane.f32.xlu1 %v1420_v19 }
 0x3c5   : > { %v2693_v20 = vpop.eup %2692 }
 0x3c6   : > { %v2695_v21 = vpop.eup %2694  ;;  %v1423_v22 = vsel %vm1084_vm2, %v2693_v20, 0.0 }
 0x3c7   : > { %1424 = vadd.xlane.f32.xlu0 %v1423_v22  ;;  %v1426_v23 = vsel %vm1084_vm2, %v2695_v21, 0.0 }
 0x3c8   : > { %1427 = vadd.xlane.f32.xlu1 %v1426_v23 }
 0x3d9   : > { %940 = vrot.lane.b32.xlu1 %v3194_v15, %s2908_s14 }
 0x3dd   : > { %942 = vrot.lane.b32.xlu0 %v3192_v14, %s2908_s14  ;;  %s2910_s14 = smov 8  }
 0x44c   : > { %v1419_v27 = vpop.xlane.xlu0 %1418 }
 0x44d   : > { %2696 = vrcp.f32 %v1419_v27 }
 0x450   : > { %v1422_v28 = vpop.xlane.xlu1 %1421 }
 0x451   : > { %2698 = vrcp.f32 %v1422_v28 }
 0x454   : > { %v1425_v29 = vpop.xlane.xlu0 %1424 }
 0x455   : > { %2700 = vrcp.f32 %v1425_v29  ;;  %v1428_v30 = vpop.xlane.xlu1 %1427 }
 0x456   : > { %2702 = vrcp.f32 %v1428_v30 }
 0x457   : > { %v2697_v31 = vpop.eup %2696 }
 0x458   : > { %v1433_v32 = vmul.f32 %v2697_v31, %v2689_v13  ;;  %v943_v15 = vpop.permute.xlu0 %942 }
 0x459   : > { %v964_v34 = vcombine.low %v939_v26, %v943_v15  ;;  %v965_v35 = vcombine.high %v939_v26, %v943_v15  ;;  %v941_v14 = vpop.permute.xlu1 %940 }
 0x45a   : > { %v948_v36 = vcombine.low %v937_v24, %v941_v14  ;;  %v949_v37 = vcombine.high %v937_v24, %v941_v14  ;;  %1437 = vst.msk [vmem:[%s3282_s24] sm:$0xff] %vm1084_vm2, %v1433_v32 }
 0x45b   : > { %v2699_v38 = vpop.eup %2698  ;;  %v972_v39 = vrot.slane %v964_v34, %v3202_v25  ;;  %v979_v40 = vrot.slane %v965_v35, %v3202_v25 }
 0x45c   : > { %v1434_v41 = vmul.f32 %v2699_v38, %v2691_v11  ;;  %v956_v42 = vrot.slane %v948_v36, %v3202_v25  ;;  %v963_v43 = vrot.slane %v949_v37, %v3202_v25  ;;  %v1887_v11 = vld [vmem:[%s3515_s3 + $0x8] sm:$0xff] }
 0x45d   : > { %v2573_v19 = vpack.c.bf16 %v1887_v11, %v1886_v18  ;;  %v2912_v11 = vmov 0  }
 0x45e   : > { %v980_v44 = vcombine.low %v956_v42, %v972_v39  ;;  %v981_v45 = vcombine.high %v956_v42, %v972_v39  ;;  %v996_v46 = vcombine.low %v963_v43, %v979_v40  ;;  %v997_v47 = vcombine.high %v963_v43, %v979_v40  ;;  %1438 = vst.msk [vmem:[%s3282_s24 + $0x8] sm:$0xff] %vm1084_vm2, %v1434_v41  ;;  %v1888_v40 = vld [vmem:[%s3515_s3 + $0x10] sm:$0xff] }
 0x45f   : > { %v2701_v48 = vpop.eup %2700  ;;  %2687 = vset.pattern.permute.xlu0 %v2912_v11 }
 0x460   : > { %v2703_v49 = vpop.eup %2702  ;;  %v1435_v50 = vmul.f32 %v2701_v48, %v2693_v20  ;;  %v988_v51 = vrot.slane %v980_v44, %v3212_v33  ;;  %v995_v52 = vrot.slane %v981_v45, %v3212_v33  ;;  %v1004_v53 = vrot.slane %v996_v46, %v3212_v33 }
 0x461   : > { %v1436_v54 = vmul.f32 %v2703_v49, %v2695_v21  ;;  %v1011_v55 = vrot.slane %v997_v47, %v3212_v33 }
 0x462   : > { %v1016_v56 = vcombine.low %v988_v51, %v995_v52  ;;  %v2402_v57 = vcombine.high %v988_v51, %v995_v52  ;;  %1439 = vst.msk [vmem:[%s3282_s24 + $0x10] sm:$0xff] %vm1084_vm2, %v1435_v50 }
 0x463   : > { %v1032_v58 = vcombine.low %v1004_v53, %v1011_v55  ;;  %v2403_v59 = vcombine.high %v1004_v53, %v1011_v55  ;;  %1440 = vst.msk [vmem:[%s3282_s24 + $0x18] sm:$0xff] %vm1084_vm2, %v1436_v54 }
 0x464   : > { %v1023_v60 = vrot.slane %v1016_v56, %v3202_v25  ;;  %v1031_v61 = vrot.slane %v2402_v57, %v3202_v25 }
 0x465   : > { %v1039_v62 = vrot.slane %v1032_v58, %v3202_v25  ;;  %v1047_v63 = vrot.slane %v2403_v59, %v3202_v25 }
 0x466   : > { %v1048_v2 = vcombine.low %v1023_v60, %v1031_v61  ;;  %v1049_v3 = vcombine.high %v1023_v60, %v1031_v61 }
 0x467   : > { %v1064_v4 = vcombine.low %v1039_v62, %v1047_v63  ;;  %v1065_v5 = vcombine.high %v1039_v62, %v1047_v63 }
 0x468   : > { %v1056_v6 = vrot.slane %v1048_v2, %v3212_v33  ;;  %v1063_v9 = vrot.slane %v1049_v3, %v3212_v33 }
 0x469   : > { %v1072_v7 = vrot.slane %v1064_v4, %v3212_v33  ;;  %v1079_v10 = vrot.slane %v1065_v5, %v3212_v33 }
 0x46b   : > { %v1080_v12 = vcombine.low %v1056_v6, %v1072_v7  ;;  %v1081_v16 = vcombine.high %v1056_v6, %v1072_v7  ;;  %v1082_v17 = vcombine.low %v1063_v9, %v1079_v10  ;;  %v1083_v13 = vcombine.high %v1063_v9, %v1079_v10  ;;  %v2418_v10 = vld [vmem:[%s3516_s4] ss:$0 sm:$0xff] }
 0x46d   : > { %2506 = vmatpush3.msra.mxu0 %v1080_v12  ;;  %2511 = vmatpush3.msra.mxu1 %v1081_v16 }
 0x46e   : > { %2508 = vmatmul.mubr.msk.f32.vlgmr.msra.gmra.mrb[2].mxu0 %vm1084_vm2, %v1433_v32  ;;  %2513 = vmatmul.mubr.msk.f32.vlgmr.msra.gmra.mrb[8].mxu1 %vm1084_vm2, %v1434_v41  ;;  %v1889_v41 = vld [vmem:[%s3515_s3 + $0x18] sm:$0xff] }
 0x46f   : > { %2515 = vmatprep.subr.mxu0 %v2901_v1  ;;  %2520 = vmatprep.subr.mxu1 %v2901_v1  ;;  %v2576_v46 = vpack.c.bf16 %v1889_v41, %v1888_v40 }
 0x470   : > { %2516 = vmatpush3.msra.mxu0 %v1082_v17  ;;  %2521 = vmatpush3.msra.mxu1 %v1083_v13 }
 0x471   : > { %2517 = vmatprep.mubr.msk.f32.mxu0 %vm2900_vm0, %v2901_v1  ;;  %2522 = vmatprep.mubr.msk.f32.mxu1 %vm2900_vm0, %v2901_v1 }
 0x472   : > { %2518 = vmatmul.mubr.msk.f32.vlgmr.msra.gmra.mrb[4].mxu0 %vm1084_vm2, %v1435_v50  ;;  %2523 = vmatmul.mubr.msk.f32.vlgmr.msra.gmra.mrb[10].mxu1 %vm1084_vm2, %v1436_v54 }
 0x473   : > { %2572 = vmatprep.subr.bf16.mxu0 %v2899_v0  ;;  %2533 = vmatprep.mubr.msk.f32.mxu0 %vm2900_vm0, %v2901_v1 }
 0x474   : > { %2578 = vmatprep.subr.bf16.mxu1 %v2899_v0  ;;  %2544 = vmatprep.mubr.msk.f32.mxu1 %vm2900_vm0, %v2901_v1 }
 0x475   : > { %2574 = vmatpush3.bf16.msra.mxu0 %v2573_v19 }
 0x476   : > { %2575 = vmatprep.subr.bf16.mxu0 %v2899_v0 }
 0x479   : > { %2577 = vmatpush3.bf16.msra.mxu0 %v2576_v46 }
 0x47a   : > { %2584 = vmatprep.subr.bf16.mxu0 %v2899_v0 }
 0x541   : > { %v1510_v20 = vpop.f32.mrb[2].mxu0  ;;  %v1583_v21 = vpop.f32.mrb[8].mxu1 }
 0x542   : > { %v2509_v22 = vpop.f32.mrb[3].mxu0  ;;  %v2514_v23 = vpop.f32.mrb[9].mxu1 }
 0x545   : > { %v1656_v24 = vpop.f32.mrb[4].mxu0  ;;  %v1729_v26 = vpop.f32.mrb[10].mxu1 }
 0x546   : > { %v1733_v27 = vcombine.low %v1510_v20, %v1656_v24  ;;  %v1734_v28 = vcombine.high %v1510_v20, %v1656_v24  ;;  %v1749_v29 = vcombine.low %v1583_v21, %v1729_v26  ;;  %v1750_v30 = vcombine.high %v1583_v21, %v1729_v26  ;;  %v2519_v31 = vpop.f32.mrb[5].mxu0  ;;  %v2524_v32 = vpop.f32.mrb[11].mxu1  ;;  %v2009_v24 = vld [vmem:[%s3519_s7 + $0x8] sm:$0xff]  ;;  %v2010_v26 = vld [vmem:[%s3519_s7 + $0x10] sm:$0xff] }
 0x547   : > { %v2094_v31 = vld [vmem:[%s3521_s9 + $0x8] sm:$0xff]  ;;  %v2095_v32 = vld [vmem:[%s3521_s9 + $0x10] sm:$0xff] }
 0x548   : > { %v1741_v15 = vrot.slane %v1733_v27, %v3202_v25  ;;  %v1748_v34 = vrot.slane %v1734_v28, %v3202_v25  ;;  %v1757_v35 = vrot.slane %v1749_v29, %v3202_v25  ;;  %v1764_v14 = vrot.slane %v1750_v30, %v3202_v25  ;;  %v2011_v28 = vld [vmem:[%s3519_s7 + $0x18] sm:$0xff]  ;;  %v2093_v30 = vld [vmem:[%s3521_s9] sm:$0xff] }
 0x549   : > { %v2582_v29 = vpack.c.bf16 %v2011_v28, %v2010_v26 }
 0x54a   : > { %v1765_v36 = vcombine.low %v1741_v15, %v1757_v35  ;;  %v1766_v37 = vcombine.high %v1741_v15, %v1757_v35  ;;  %v1781_v38 = vcombine.low %v1748_v34, %v1764_v14  ;;  %v1782_v39 = vcombine.high %v1748_v34, %v1764_v14  ;;  %v2096_v34 = vld [vmem:[%s3521_s9 + $0x18] sm:$0xff]  ;;  %v2097_v14 = vld [vmem:[%s3521_s9 + $0x20] sm:$0xff] }
 0x54b   : > { %v2585_v15 = vpack.c.bf16 %v2094_v31, %v2093_v30  ;;  %v2588_v35 = vpack.c.bf16 %v2096_v34, %v2095_v32 }
 0x54c   : > { %v1773_v42 = vrot.slane %v1765_v36, %v3212_v33  ;;  %v1780_v43 = vrot.slane %v1766_v37, %v3212_v33  ;;  %v1789_v44 = vrot.slane %v1781_v38, %v3212_v33  ;;  %v1796_v45 = vrot.slane %v1782_v39, %v3212_v33  ;;  %v2098_v36 = vld [vmem:[%s3521_s9 + $0x28] sm:$0xff] }
 0x54d   : > { %v2591_v37 = vpack.c.bf16 %v2098_v36, %v2097_v14 }
 0x54e   : > { %v1801_v47 = vcombine.low %v1773_v42, %v1780_v43  ;;  %v2416_v48 = vcombine.high %v1773_v42, %v1780_v43  ;;  %v1817_v49 = vcombine.low %v1789_v44, %v1796_v45  ;;  %v2417_v50 = vcombine.high %v1789_v44, %v1796_v45  ;;  %v2420_v42 = vld [vmem:[#allocation2] ss:$0 sm:$0xff]  ;;  %v2421_v44 = vld [vmem:[#allocation5] ss:$0 sm:$0xff] }
 0x550   : > { %v1808_v51 = vrot.slane %v1801_v47, %v3202_v25  ;;  %v1816_v52 = vrot.slane %v2416_v48, %v3202_v25  ;;  %v1824_v53 = vrot.slane %v1817_v49, %v3202_v25  ;;  %v1832_v54 = vrot.slane %v2417_v50, %v3202_v25  ;;  %v2100_v49 = vld [vmem:[%s3521_s9 + $0x38] sm:$0xff] }
 0x552   : > { %v1834_v55 = vcombine.high %v1808_v51, %v1816_v52  ;;  %v1850_v56 = vcombine.high %v1824_v53, %v1832_v54  ;;  %v1833_v57 = vcombine.low %v1808_v51, %v1816_v52  ;;  %v1849_v58 = vcombine.low %v1824_v53, %v1832_v54  ;;  %v2422_v51 = vld [vmem:[#allocation7] ss:$0 sm:$0xff] }
 0x554   : > { %v1848_v59 = vrot.slane %v1834_v55, %v3212_v33  ;;  %v1864_v60 = vrot.slane %v1850_v56, %v3212_v33  ;;  %v1841_v61 = vrot.slane %v1833_v57, %v3212_v33  ;;  %v1857_v62 = vrot.slane %v1849_v58, %v3212_v33  ;;  %v2424_v56 = vld [vmem:[%s3522_s10] ss:$0 sm:$0xff] }
 0x556   : > { %v1867_v63 = vcombine.low %v1848_v59, %v1864_v60  ;;  %v1866_v2 = vcombine.high %v1841_v61, %v1857_v62  ;;  %v1868_v3 = vcombine.high %v1848_v59, %v1864_v60  ;;  %v1865_v4 = vcombine.low %v1841_v61, %v1857_v62 }
 0x558   : > { %1874 = vrot.lane.b32.xlu0 %v1867_v63, %s2909_s29  ;;  %1870 = vrot.lane.b32.xlu1 %v1866_v2, %s2910_s14  ;;  %s3425_s29 = scalar_lea.hbm %s3527_s15, %s3538_s20 }
 0x55c   : > { %1878 = vrot.lane.b32.xlu1 %v1868_v3, %s2911_s27  ;;  %s2245_s27 = sshll.u32 %s3282_s24, 4  ;;  %s3428_s27 = int_to_ptr.vmem [resolvable:$true] %s2245_s27 }
 0x55d   : > { %s2792_s25 = scalar_lea.vmem %s3428_s27, 512  ;;  %p2799_p4 = scmp.lt.s32.totalorder %s3428_s27, %s2797_s12 }
 0x55e   : > { %p2793_p12 = scmp.ne.s32.totalorder %s3428_s27, %s2792_s25 }
 0x560   : > { %p2794_p2 = pnand %p2793_p12, %p3558_p10 }
 0x562   : > { %p2795_p3 = pneg %p2794_p2 }
 0x5ca   : > { %v1871_v25 = vpop.permute.xlu1 %1870  ;;  %v1875_v5 = vpop.permute.xlu0 %1874 }
 0x5cb   : > { %v1881_v6 = vsel %vm1084_vm2, %v1865_v4, %v1871_v25 }
 0x5cc   : > { %v1883_v33 = vsel %vm1882_vm3, %v1881_v6, %v1875_v5 }
 0x5ce   : > { %v1879_v7 = vpop.permute.xlu1 %1878 }
 0x5cf   : > { %v1885_v9 = vsel %vm1884_vm4, %v1883_v33, %v1879_v7 }
 0x5d0   : > { %2534 = vmatmul.mubr.msk.f32.vlgmr.msra.gmra.mrb[6].mxu0 %vm568_vm1, %v1885_v9 }
 0x5d1   : > { %2563 = vmatprep.mubr.msk.f32.mxu0 %vm2900_vm0, %v2901_v1  ;;  %v2001_v1 = vld [vmem:[%s555_s21] sm:$0xff]  ;;  %2586 = vmatpush3.bf16.msra.mxu0 %v2585_v15  ;;  %s2798_s21 = scalar_lea.vmem %s2797_s12, 1024 }
 0x5d2   : > { %2587 = vmatprep.subr.bf16.mxu0 %v2899_v0  ;;  %p2800_p7 = scmp.lt.s32.totalorder %s2798_s21, %s2792_s25 }
 0x5d4   : > { %p2801_p8 = por %p2800_p7, %p2799_p4 }
 0x5d5   : > { %2589 = vmatpush3.bf16.msra.mxu0 %v2588_v35 }
 0x5d6   : > { %2590 = vmatprep.subr.bf16.mxu0 %v2899_v0  ;;  %p2802_p11 = pnand %p2801_p8, %p2795_p3 }
 0x5d9   : > { %2592 = vmatpush3.bf16.msra.mxu0 %v2591_v37 }
 0x5da   : > { %2593 = vmatprep.subr.bf16.mxu0 %v2899_v0 }
 0x6a3   : > { %v1966_v12 = vpop.f32.mrb[6].mxu0 }
 0x6a4   : > { %v1967_v16 = vadd.f32 %v2418_v10, %v1966_v12  ;;  %v2535_v17 = vpop.f32.mrb[7].mxu0 }
 0x6a6   : > { %v1970_v13 = vadd.f32 %v1967_v16, %v3173_v8  ;;  %v2008_v8 = vld [vmem:[%s3519_s7] sm:$0xff] }
 0x6a7   : > { %v2579_v27 = vpack.c.bf16 %v2009_v24, %v2008_v8 }
 0x6a8   : > { %v1973_v18 = vsel %vm568_vm1, %v1970_v13, 0.0 }
 0x6a9   : > { %1974 = vadd.xlane.f32.xlu0 %v1973_v18  ;;  %2580 = vmatpush3.bf16.msra.mxu1 %v2579_v27 }
 0x6aa   : > { %2581 = vmatprep.subr.bf16.mxu1 %v2899_v0  ;;  %v2099_v0 = vld [vmem:[%s3521_s9 + $0x30] sm:$0xff] }
 0x6ab   : > { %v2594_v50 = vpack.c.bf16 %v2100_v49, %v2099_v0 }
 0x6ad   : > { %2583 = vmatpush3.bf16.msra.mxu1 %v2582_v29  ;;  %2595 = vmatpush3.bf16.msra.mxu0 %v2594_v50 }
 0x6bf   : > { %2004 = vperm.xlu0 %2687, %v2001_v1  }
 0x736   : > { %v1975_v19 = vpop.xlane.xlu0 %1974 }
 0x737   : > { %v1977_v20 = vmul.f32 0.03125, %v1975_v19 }
 0x739   : > { %v1978_v21 = vsub.f32 %v1970_v13, %v1977_v20 }
 0x73b   : > { %v1979_v22 = vmul.f32 %v1978_v21, %v1978_v21 }
 0x73d   : > { %v1980_v23 = vsel %vm568_vm1, %v1979_v22, 0.0 }
 0x73e   : > { %1981 = vadd.xlane.f32.xlu1 %v1980_v23  ;;  %v3404_v46 = vpop.permute.xlu0 %2004 }
 0x7cb   : > { %v1982_v38 = vpop.xlane.xlu1 %1981 }
 0x7cc   : > { %v1983_v39 = vmul.f32 0.03125, %v1982_v38 }
 0x7ce   : > { %v1984_v40 = vadd.f32 1e-05, %v1983_v39 }
 0x7d0   : > { %2704 = vrsqrt.f32 %v1984_v40 }
 0x7da   : > { %v2705_v41 = vpop.eup %2704 }
 0x7db   : > { %v1986_v43 = vmul.f32 %v2705_v41, %v1978_v21 }
 0x7dd   : > { %v1993_v45 = vmul.f32 %v2420_v42, %v1986_v43 }
 0x7df   : > { %v2000_v47 = vadd.f32 %v2421_v44, %v1993_v45 }
 0x7e1   : > { %v2007_v48 = vmul.f32 %v3404_v46, %v2000_v47 }
 0x7e3   : > { %2545 = vmatmul.mubr.msk.f32.vlgmr.msra.gmra.mrb[12].mxu1 %vm568_vm1, %v2007_v48 }
 0x8b6   : > { %v2088_v52 = vpop.f32.mrb[12].mxu1 }
 0x8b7   : > { %v2089_v53 = vadd.f32 %v2422_v51, %v2088_v52  ;;  %v2546_v54 = vpop.f32.mrb[13].mxu1 }
 0x8b9   : > { %v2092_v55 = vmax.f32 %v2089_v53, 0.0 }
 0x8bb   : > { %2564 = vmatmul.mubr.msk.f32.vlgmr.msra.gmra.mrb[8].mxu0 %vm2108_vm5, %v2092_v55 }
 0x98e   : > { %v2178_v57 = vpop.f32.mrb[8].mxu0 }
 0x98f   : > { %v2179_v58 = vadd.f32 %v2424_v56, %v2178_v57  ;;  %v2565_v59 = vpop.f32.mrb[9].mxu0 }
 0x991   : > { %v2182_v60 = vadd.f32 %v2179_v58, %v2007_v48 }
 0x993   : > { %v2185_v61 = vsel %vm568_vm1, %v2182_v60, 0.0 }
 0x994   : > { %2186 = vadd.xlane.f32.xlu1 %v2185_v61 }
 0xa21   : > { %v2187_v62 = vpop.xlane.xlu1 %2186 }
 0xa22   : > { %v2188_v63 = vmul.f32 0.03125, %v2187_v62 }
 0xa24   : > { %v2189_v2 = vsub.f32 %v2182_v60, %v2188_v63 }
 0xa26   : > { %v2190_v3 = vmul.f32 %v2189_v2, %v2189_v2 }
 0xa28   : > { %v2191_v4 = vsel %vm568_vm1, %v2190_v3, 0.0 }
 0xa29   : > { %2192 = vadd.xlane.f32.xlu1 %v2191_v4 }
 0xa2a   : > { %2805 = shalt.err (!%p2802_p11)
}
 0xa2b   : > { %s2806_s24 = scalar_lea.hbm %s3425_s29, 512  ;;  %s2810_s23 = scalar_lea.hbm %s3527_s15, 1024 }
 0xa2c   : > { %p2807_p13 = scmp.ne.s32.totalorder %s3425_s29, %s2806_s24  ;;  %p2811_p6 = scmp.lt.u32.totalorder %s3425_s29, %s3527_s15 }
 0xa2d   : > { %p2812_p5 = scmp.lt.u32.totalorder %s2810_s23, %s2806_s24  ;;  %p2814_p12 = scmp.lt.u32.totalorder %s2806_s24, %s3425_s29 }
 0xa2e   : > { %p2808_p0 = pnand %p2807_p13, %p3558_p10 }
 0xa2f   : > { %p2813_p9 = por %p2812_p5, %p2811_p6 }
 0xa30   : > { %p2809_p1 = pneg %p2808_p0 }
 0xa31   : > { %p2815_p2 = por %p2814_p12, %p2813_p9 }
 0xa33   : > { %p2816_p3 = pnand %p2815_p2, %p2809_p1 }
 0xa35   : > { %2819 = shalt.err (!%p2816_p3)
}
 0xa36   : > { %s2914_s25 = smov 128   ;;  %s2915_s12 = smov 256  }
 0xa37   : > { %2609 = dma.vmem_to_hbm [thread:$0]  (%p3558_p10), %s3428_s27, 512, %s3425_s29, %s2220_s17, %s2914_s25, %s2915_s12, %s2910_s14  }
 0xa38   : > { %s2392_s21 = sshll.u32 %s3279_s16, 3  ;;  %s3559_s26 = sld [smem:[#allocation21_spill]] }
 0xa39   : > { %s3560_s11 = sld [smem:[#allocation22_spill]]  ;;  %s540_s20 = scalar_lea.vmem [#allocation8], %s2392_s21 }
 0xa3a   : > { %s2233_s14 = sshll.u32 %s540_s20, 4  ;;  %s3561_s29 = sshll.u32 %s3018_s22, 7  ;;  %s3470_s14 = int_to_ptr.vmem [resolvable:$true] %s2233_s14 }
 0xa3b   : > { %s3562_s25 = sld [smem:[#allocation23_spill]]  ;;  %s2215_s24 = scalar_lea.sflag [#allocation4], %s3279_s16 }
 0xa3c   : > { %s2820_s30 = scalar_lea.vmem %s3470_s14, 128  ;;  %s2916_s21 = smov [#allocation8]  }
 0xa3d   : > { %p2821_p4 = scmp.ne.s32.totalorder %s3470_s14, %s2820_s30  ;;  %s2824_s22 = sshll.u32 %s2916_s21, 4  ;;  %s2825_s22 = int_to_ptr.vmem [resolvable:$false] %s2824_s22 }
 0xa3e   : > { %v2426_v33 = vld [vmem:[%s3559_s26] ss:$0 sm:$0xff]  ;;  %s2826_s26 = scalar_lea.vmem %s2825_s22, 256  ;;  %p2827_p11 = scmp.lt.s32.totalorder %s3470_s14, %s2825_s22 }
 0xa3f   : > { %v2427_v10 = vld [vmem:[%s3560_s11] ss:$0 sm:$0xff]  ;;  %p2822_p7 = pnand %p2821_p4, %p3558_p10  ;;  %p2828_p13 = scmp.lt.s32.totalorder %s2826_s26, %s2820_s30 }
 0xa41   : > { %s3468_s12 = scalar_lea.hbm %s3562_s25, %s3561_s29  ;;  %p2823_p8 = pneg %p2822_p7 }
 0xa42   : > { %p2829_p0 = por %p2828_p13, %p2827_p11 }
 0xa44   : > { %p2830_p1 = pnand %p2829_p0, %p2823_p8 }
 0xab6   : > { %v2193_v25 = vpop.xlane.xlu1 %2192 }
 0xab7   : > { %v2194_v5 = vmul.f32 0.03125, %v2193_v25 }
 0xab9   : > { %v2195_v6 = vadd.f32 1e-05, %v2194_v5 }
 0xabb   : > { %2706 = vrsqrt.f32 %v2195_v6 }
 0xac5   : > { %v2707_v7 = vpop.eup %2706 }
 0xac6   : > { %v2197_v9 = vmul.f32 %v2707_v7, %v2189_v2 }
 0xac8   : > { %v2204_v12 = vmul.f32 %v2426_v33, %v2197_v9 }
 0xaca   : > { %v2211_v16 = vadd.f32 %v2427_v10, %v2204_v12 }
 0xacc   : > { %v2212_v17 = vmul.f32 %v2211_v16, %v3404_v46 }
 0xace   : > { %2213 = vst.msk [vmem:[%s540_s20] sm:$0xff] %vm568_vm1, %v2212_v17 }
 0xacf   : > { %2833 = shalt.err (!%p2830_p1)
}
 0xad0   : > { %s2834_s16 = scalar_lea.hbm %s3468_s12, 128  ;;  %s2838_s18 = scalar_lea.hbm %s3562_s25, 256 }
 0xad1   : > { %p2835_p6 = scmp.ne.s32.totalorder %s3468_s12, %s2834_s16  ;;  %p2839_p12 = scmp.lt.u32.totalorder %s3468_s12, %s3562_s25 }
 0xad2   : > { %p2840_p2 = scmp.lt.u32.totalorder %s2838_s18, %s2834_s16  ;;  %p2842_p4 = scmp.lt.u32.totalorder %s2834_s16, %s3468_s12 }
 0xad3   : > { %p2836_p5 = pnand %p2835_p6, %p3558_p10 }
 0xad4   : > { %p2841_p3 = por %p2840_p2, %p2839_p12 }
 0xad5   : > { %p2837_p9 = pneg %p2836_p5 }
 0xad6   : > { %p2843_p7 = por %p2842_p4, %p2841_p3 }
 0xad8   : > { %p2844_p8 = pnand %p2843_p7, %p2837_p9 }
 0xada   : > { %2847 = shalt.err (!%p2844_p8)
}
 0xadb   : > { %2608 = dma.vmem_to_hbm [thread:$0]  (%p3558_p10), %s3470_s14, 128, %s3468_s12, %s2215_s24  }
 0xadc PF: > { %s3563_s27 = sld [smem:[#allocation17_spill]]  ;;  %s3564_s17 = sld [smem:[#allocation15_spill]] }
 0xadd   : > { %s3565_s30 = sld [smem:[#allocation20_spill]] }
 0xae2   : > { %p2635_p11 = scmp.ge.s32.totalorder %s3563_s27, 2  ;;  %s2260_s21 = sand.u32 1, %s3564_s17  }
 0xae3   : > { %p3566_p13 = scmp.ne.s32.totalorder %s3565_s30, 0  ;;  %s2261_s22 = scalar_lea.sflag [#allocation4], %s2260_s21 }
 0xae5   : > { %p2623_p0 = pnand %p2635_p11, %p3566_p13 }
 0xae7   : > { %2873 = dma.done.wait (!%p2623_p0), %s2261_s22, 128  }
 0xae8   : > { %2875 = vsyncadd (!%p2623_p0), %s2261_s22, 4294967168  ;;  %s2270_s26 = scalar_lea.sflag [#allocation10], %s2260_s21 }
 0xae9   : > { %2877 = dma.done.wait (!%p2623_p0), %s2270_s26, 512  }
 0xaea   : > { %2879 = vsyncadd (!%p2623_p0), %s2270_s26, 4294966784  ;;  %s3567_s21 = sld [smem:[#allocation18_spill]]  ;;  %s3568_s28 = sld [smem:[#allocation16_spill]] }
 0xaeb   : > { %s3569_s20 = sld [smem:[#allocation19_spill]]  ;;  %s3570_s18 = smov %s2886_s19 }
 0xaf0   : > { %p31_p10 = scmp.ge.s32.totalorder %s3567_s21, 4   ;;  %s3571_s19 = smov %s3568_s28 }
 0xaf2   :  { %33 = sbr.rel (!%p31_p10) target bundleno = 11 (0xb), region = 144 }
 0xaf9   :  { %2275 = vsyncpa [#allocation3], 1 }
 0xafa   :  { %2277 = vsyncpa [#allocation3 + $0x1], 1 }
 0xafb   :  { %2278 = vsyncpa [#allocation6], 1 }
 0xafc   :  { %2279 = vsyncpa [#allocation4], 1 }
 0xafd   :  { %2281 = vsyncpa [#allocation4 + $0x1], 1 }
 0xafe   :  { %2282 = vsyncpa [#allocation10], 1 }
 0xaff   :  { %2284 = vsyncpa [#allocation10 + $0x1], 1 }

</bundles_post_ra>
